<compile_context>
chip_gen: v7x
topology: tpu7x:2x2x1
jax: 0.10.0
libtpu: 0.0.40
codegen_flags: <defaults>
</compile_context>

<pallas_src>
import functools

import jax
import jax.numpy as jnp
import numpy as np
from jax.experimental import pallas as pl
from jax.experimental.pallas import tpu as pltpu


# ----------------------------------------------------------------------------
# Pallas kernel: one TransformerEncoderLayer step for one block of sequences.
# Grid = (batch_block, layer); activation carried across the layer axis in a
# VMEM scratch; the output block is written only on the last layer.
# ----------------------------------------------------------------------------
def encoder_layer_kernel(x_ref, wqkv_ref, bqkv_ref, wo_ref, bo_ref,
                         g1_ref, be1_ref, wf1_ref, bf1_ref,
                         wf2_ref, bf2_ref, g2_ref, be2_ref,
                         o_ref, act_ref, ctx_ref, *, heads_num, d_k, eps):
    layer = pl.program_id(1)
    n_layers = pl.num_programs(1)

    b_blk, S, D = x_ref.shape
    M = b_blk * S

    # Layer 0: load the embedded input block into the resident f32 carry.
    @pl.when(layer == 0)
    def _():
        act_ref[...] = x_ref[...].reshape(M, D).astype(jnp.float32)

    x = act_ref[...]                                    # (M, D) f32
    xb = x.astype(jnp.bfloat16)

    # ---- fused QKV projection (1/sqrt(d_k) already folded into Wq, bq) ----
    qkv = jnp.dot(xb, wqkv_ref[...], preferred_element_type=jnp.float32)
    qkv = qkv + bqkv_ref[...]                           # (M, 3D) f32

    q3 = qkv[:, :D].reshape(b_blk, S, D)
    k3 = qkv[:, D:2 * D].reshape(b_blk, S, D)
    v3 = qkv[:, 2 * D:].reshape(b_blk, S, D)

    # ---- per-head attention, batched over the sequence block ----
    # Heads are a short static unroll; each head's context is stored into a
    # VMEM scratch slice (no concatenate / lane relayout, bounded live ranges).
    for h in range(heads_num):
        sl = slice(h * d_k, (h + 1) * d_k)
        qh = q3[:, :, sl].astype(jnp.bfloat16)          # (b_blk, S, d_k)
        kh = k3[:, :, sl].astype(jnp.bfloat16)
        vh = v3[:, :, sl].astype(jnp.bfloat16)
        # contraction over the shared last dim -> no explicit kh.T transpose
        s = jnp.einsum('bqd,bkd->bqk', qh, kh,
                       preferred_element_type=jnp.float32)      # (b_blk, S, S)
        m = jnp.max(s, axis=-1, keepdims=True)
        e = jnp.exp(s - m)
        p = e * pl.reciprocal(jnp.sum(e, axis=-1, keepdims=True), approx=True)
        ctxh = jnp.einsum('bqk,bkd->bqd', p.astype(jnp.bfloat16), vh,
                          preferred_element_type=jnp.float32)   # (b_blk, S, d_k)
        ctx_ref[:, sl] = ctxh.reshape(M, d_k).astype(jnp.bfloat16)

    # ---- single full-width output projection ----
    attn = jnp.dot(ctx_ref[...], wo_ref[...],
                   preferred_element_type=jnp.float32) + bo_ref[...]

    # ---- residual + LayerNorm (self-attention block), f32 statistics ----
    h1 = attn + x
    mu1 = jnp.mean(h1, axis=-1, keepdims=True)
    var1 = jnp.mean((h1 - mu1) ** 2, axis=-1, keepdims=True)
    h1n = (h1 - mu1) * jax.lax.rsqrt(var1 + eps)
    h1n = h1n * g1_ref[...] + be1_ref[...]

    # ---- FFN: Linear -> ReLU -> Linear (bf16 operands, f32 accumulation) ----
    f = jnp.dot(h1n.astype(jnp.bfloat16), wf1_ref[...],
                preferred_element_type=jnp.float32) + bf1_ref[...]
    f = jnp.maximum(f, 0.0)
    f = jnp.dot(f.astype(jnp.bfloat16), wf2_ref[...],
                preferred_element_type=jnp.float32) + bf2_ref[...]

    # ---- residual + LayerNorm (FFN block) ----
    h2 = f + h1n
    mu2 = jnp.mean(h2, axis=-1, keepdims=True)
    var2 = jnp.mean((h2 - mu2) ** 2, axis=-1, keepdims=True)
    out = (h2 - mu2) * jax.lax.rsqrt(var2 + eps)
    out = out * g2_ref[...] + be2_ref[...]

    # Carry the activation to the next layer iteration.
    act_ref[...] = out

    # Only the last layer's result is written to HBM (lane-dense D block).
    @pl.when(layer == n_layers - 1)
    def _():
        o_ref[...] = out.reshape(b_blk, S, D).astype(o_ref.dtype)


# ----------------------------------------------------------------------------
# Wrapper: whole encoder stack in one pallas_call.
# ----------------------------------------------------------------------------
def encoder_stack_forward(x, p, *, heads_num, eps, b_blk=None):
    B, S, D = x.shape
    n_layers = p["wqkv"].shape[0]
    d_ff = p["w_ff1"].shape[-1]
    d_k = D // heads_num

    # Pick a batch block so B_blk * S ~ 256 rows (fat MXU M) and B_blk | B.
    if b_blk is None:
        target = max(1, 256 // S)
        b_blk = max(d for d in range(1, B + 1) if B % d == 0 and d <= target)
    nbb = B // b_blk

    def wspec(*shape):
        n = len(shape)
        # Per-layer weight slab: block index follows the layer grid axis only.
        return pl.BlockSpec((None,) + shape, lambda bb, l, _n=n: (l,) + (0,) * _n)

    kernel = functools.partial(encoder_layer_kernel,
                               heads_num=heads_num, d_k=d_k, eps=eps)

    # Explicit scoped-VMEM budget: double-buffered bf16 per-layer weights +
    # activation blocks + scratches, with generous headroom (defaults are only
    # 16 MiB on v5e / 32 MiB on v6e+v7x).
    wbytes = 2 * (D * 3 * D + D * D + D * d_ff + d_ff * D)       # bf16 weights
    abytes = 4 * (b_blk * S * D)                                 # f32 act block
    vmem_limit = int(min(48 * 1024 * 1024,
                         max(32 * 1024 * 1024, 4 * (2 * wbytes + 8 * abytes))))

    return pl.pallas_call(
        kernel,
        out_shape=jax.ShapeDtypeStruct((B, S, D), jnp.float32),
        grid=(nbb, n_layers),
        in_specs=[
            pl.BlockSpec((b_blk, S, D), lambda bb, l: (bb, 0, 0)),  # x (bf16)
            wspec(D, 3 * D),                                        # W_qkv (bf16)
            wspec(1, 3 * D),                                        # b_qkv
            wspec(D, D),                                            # W_o (bf16)
            wspec(1, D),                                            # b_o
            wspec(1, D), wspec(1, D),                               # LN1 gamma/beta
            wspec(D, d_ff), wspec(1, d_ff),                         # FFN linear1
            wspec(d_ff, D), wspec(1, D),                            # FFN linear2
            wspec(1, D), wspec(1, D),                               # LN2 gamma/beta
        ],
        out_specs=pl.BlockSpec((b_blk, S, D), lambda bb, l: (bb, 0, 0)),
        scratch_shapes=[pltpu.VMEM((b_blk * S, D), jnp.float32),    # resident act
                        pltpu.VMEM((b_blk * S, D), jnp.bfloat16)],  # concat-heads ctx
        compiler_params=pltpu.CompilerParams(
            dimension_semantics=("parallel", "arbitrary"),
            vmem_limit_bytes=vmem_limit),
    )(x, p["wqkv"], p["bqkv"], p["wo"], p["bo"],
      p["ln1_g"], p["ln1_b"], p["w_ff1"], p["b_ff1"],
      p["w_ff2"], p["b_ff2"], p["ln2_g"], p["ln2_b"])


# ----------------------------------------------------------------------------
# Glue: embedding lookup + sinusoidal positional encoding, then the stack.
# ----------------------------------------------------------------------------
def make_positional_encoding(max_len, d_model):
    pos = np.arange(max_len, dtype=np.float64)[:, None]
    i = np.arange(d_model, dtype=np.float64)[None, :]
    angle = pos / np.power(10000.0, (2.0 * (i // 2)) / d_model)
    pe = np.where(i % 2 == 0, np.sin(angle), np.cos(angle))
    return jnp.asarray(pe, dtype=jnp.float32)                 # (max_len, D)


def transformer_encoder_forward(tokens, emb_table, pe_table, params,
                                *, heads_num, eps):
    # Embedding (pad_idx row zeroed in the table) + positional encoding: glue.
    x = jnp.take(emb_table, tokens, axis=0)                   # (B, S, D) f32
    S = tokens.shape[1]
    x = x + pe_table[:S][None, :, :]
    # Feed the kernel bf16 (halves input DMA; f32 carry rebuilt in-kernel).
    x = x.astype(jnp.bfloat16)
    # Hot path: the whole encoder stack is one Pallas kernel.
    return encoder_stack_forward(x, params, heads_num=heads_num, eps=eps)


# ----------------------------------------------------------------------------
# Deterministic synthetic parameters (stacked along a leading layer axis).
# ----------------------------------------------------------------------------
def init_params(key, vocab_size, max_len, pad_idx, d_model, N, d_ff, heads_num):
    k_emb, k_w = jax.random.split(key)

    emb = 0.02 * jax.random.normal(k_emb, (vocab_size, d_model), jnp.float32)
    emb = emb.at[pad_idx].set(0.0)                            # padding_idx row = 0

    ks = jax.random.split(k_w, 8)
    bf16 = jnp.bfloat16
    d_k = d_model // heads_num
    scale = 1.0 / float(d_k) ** 0.5

    wqkv = 0.05 * jax.random.normal(ks[0], (N, d_model, 3 * d_model), jnp.float32)
    bqkv = 0.01 * jax.random.normal(ks[1], (N, 1, 3 * d_model), jnp.float32)
    # Fold the 1/sqrt(d_k) attention scale into the Q projection (weights AND
    # bias) — equivalent to scaling q post-projection, but free at runtime.
    wqkv = wqkv.at[:, :, :d_model].multiply(scale)
    bqkv = bqkv.at[:, :, :d_model].multiply(scale)

    params = dict(
        wqkv=wqkv.astype(bf16),
        bqkv=bqkv,
        wo=(0.05 * jax.random.normal(ks[2], (N, d_model, d_model),
                                     jnp.float32)).astype(bf16),
        bo=0.01 * jax.random.normal(ks[3], (N, 1, d_model), jnp.float32),
        ln1_g=jnp.ones((N, 1, d_model), jnp.float32),
        ln1_b=jnp.zeros((N, 1, d_model), jnp.float32),
        w_ff1=(0.05 * jax.random.normal(ks[4], (N, d_model, d_ff),
                                        jnp.float32)).astype(bf16),
        b_ff1=0.01 * jax.random.normal(ks[5], (N, 1, d_ff), jnp.float32),
        w_ff2=(0.05 * jax.random.normal(ks[6], (N, d_ff, d_model),
                                        jnp.float32)).astype(bf16),
        b_ff2=0.01 * jax.random.normal(ks[7], (N, 1, d_model), jnp.float32),
        ln2_g=jnp.ones((N, 1, d_model), jnp.float32),
        ln2_b=jnp.zeros((N, 1, d_model), jnp.float32),
    )
    pe = make_positional_encoding(max_len, d_model)
    return emb, pe, params


if __name__ == "__main__":
    # Small shapes consistent with the module's forward.
    vocab_size, max_len, pad_idx = 50, 16, 0
    d_model, N_layers, d_ff, heads_num = 128, 2, 256, 4   # lane-dense d_model
    layer_norm_eps = 1e-5
    B, S = 4, 8

    key = jax.random.PRNGKey(0)
    k_tok, k_par = jax.random.split(key)
    tokens = jax.random.randint(k_tok, (B, S), 0, vocab_size, dtype=jnp.int32)

    emb_table, pe_table, params = init_params(
        k_par, vocab_size, max_len, pad_idx, d_model, N_layers, d_ff, heads_num)

    out = transformer_encoder_forward(
        tokens, emb_table, pe_table, params,
        heads_num=heads_num, eps=layer_norm_eps)
    out = jax.block_until_ready(out)

    assert out.shape == (B, S, d_model)
    assert bool(jnp.all(jnp.isfinite(out)))
    print("KERNEL_OK")
</pallas_src>

<mosaic_0001>
module attributes {stable_mosaic.version = 11 : i64} {
  func.func @encoder_layer_kernel(%arg0: i32, %arg1: i32, %arg2: memref<4x8x128xbf16, #tpu.memory_space<vmem>>, %arg3: memref<1x128x384xbf16, #tpu.memory_space<vmem>>, %arg4: memref<1x1x384xf32, #tpu.memory_space<vmem>>, %arg5: memref<1x128x128xbf16, #tpu.memory_space<vmem>>, %arg6: memref<1x1x128xf32, #tpu.memory_space<vmem>>, %arg7: memref<1x1x128xf32, #tpu.memory_space<vmem>>, %arg8: memref<1x1x128xf32, #tpu.memory_space<vmem>>, %arg9: memref<1x128x256xbf16, #tpu.memory_space<vmem>>, %arg10: memref<1x1x256xf32, #tpu.memory_space<vmem>>, %arg11: memref<1x256x128xbf16, #tpu.memory_space<vmem>>, %arg12: memref<1x1x128xf32, #tpu.memory_space<vmem>>, %arg13: memref<1x1x128xf32, #tpu.memory_space<vmem>>, %arg14: memref<1x1x128xf32, #tpu.memory_space<vmem>>, %arg15: memref<4x8x128xf32, #tpu.memory_space<vmem>>, %arg16: memref<32x128xf32, #tpu.memory_space<vmem>>, %arg17: memref<32x128xbf16, #tpu.memory_space<vmem>>) attributes {dimension_semantics = [#tpu.dimension_semantics<parallel>, #tpu.dimension_semantics<arbitrary>], iteration_bounds = array<i64: 1, 2>, scalar_prefetch = 0 : i64, scratch_operands = 2 : i64, tpu.core_type = #tpu.core_type<tc>, window_params = [{transform_indices = @transform_0, window_bounds = array<i64: 4, 8, 128>}, {transform_indices = @transform_1, window_bounds = array<i64: 1, 128, 384>}, {transform_indices = @transform_2, window_bounds = array<i64: 1, 1, 384>}, {transform_indices = @transform_3, window_bounds = array<i64: 1, 128, 128>}, {transform_indices = @transform_4, window_bounds = array<i64: 1, 1, 128>}, {transform_indices = @transform_5, window_bounds = array<i64: 1, 1, 128>}, {transform_indices = @transform_6, window_bounds = array<i64: 1, 1, 128>}, {transform_indices = @transform_7, window_bounds = array<i64: 1, 128, 256>}, {transform_indices = @transform_8, window_bounds = array<i64: 1, 1, 256>}, {transform_indices = @transform_9, window_bounds = array<i64: 1, 256, 128>}, {transform_indices = @transform_10, window_bounds = array<i64: 1, 1, 128>}, {transform_indices = @transform_11, window_bounds = array<i64: 1, 1, 128>}, {transform_indices = @transform_12, window_bounds = array<i64: 1, 1, 128>}, {transform_indices = @transform_13, window_bounds = array<i64: 4, 8, 128>}]} {
    %c0_i32 = arith.constant 0 : i32
    %0 = arith.cmpi eq, %arg1, %c0_i32 : i32
    %1 = arith.extui %0 : i1 to i32
    %c0_i32_0 = arith.constant 0 : i32
    %2 = arith.cmpi ne, %1, %c0_i32_0 : i32
    scf.if %2 {
      %c0_78 = arith.constant 0 : index
      %c0_79 = arith.constant 0 : index
      %c0_80 = arith.constant 0 : index
      %190 = vector.load %arg2[%c0_78, %c0_79, %c0_80] : memref<4x8x128xbf16, #tpu.memory_space<vmem>>, vector<4x8x128xbf16>
      %191 = vector.shape_cast %190 : vector<4x8x128xbf16> to vector<32x128xbf16>
      %192 = arith.extf %191 : vector<32x128xbf16> to vector<32x128xf32>
      %c0_81 = arith.constant 0 : index
      %c0_82 = arith.constant 0 : index
      %193 = vector.load %arg16[%c0_81, %c0_82] : memref<32x128xf32, #tpu.memory_space<vmem>>, vector<32x128xf32>
      tpu.vector_store %arg16[%c0_81, %c0_82], %192 {strides = array<i32>} : memref<32x128xf32, #tpu.memory_space<vmem>>, vector<32x128xf32>,
    } else {
    }
    %c0 = arith.constant 0 : index
    %c0_1 = arith.constant 0 : index
    %3 = vector.load %arg16[%c0, %c0_1] : memref<32x128xf32, #tpu.memory_space<vmem>>, vector<32x128xf32>
    %4 = arith.truncf %3 : vector<32x128xf32> to vector<32x128xbf16>
    %c0_2 = arith.constant 0 : index
    %c0_3 = arith.constant 0 : index
    %c0_4 = arith.constant 0 : index
    %5 = vector.load %arg3[%c0_2, %c0_3, %c0_4] : memref<1x128x384xbf16, #tpu.memory_space<vmem>>, vector<1x128x384xbf16>
    %6 = vector.shape_cast %5 : vector<1x128x384xbf16> to vector<128x384xbf16>
    %cst = arith.constant dense<0.000000e+00> : vector<32x384xf32>
    %7 = tpu.matmul %4, %6, %cst {dimension_numbers = #tpu.dot_dimension_numbers<[1], [0], [0], [1], [0, 0, 1, 1], [], []>} : vector<32x128xbf16>, vector<128x384xbf16>, vector<32x384xf32> -> vector<32x384xf32>
    %c0_5 = arith.constant 0 : index
    %c0_6 = arith.constant 0 : index
    %c0_7 = arith.constant 0 : index
    %8 = vector.load %arg4[%c0_5, %c0_6, %c0_7] : memref<1x1x384xf32, #tpu.memory_space<vmem>>, vector<1x1x384xf32>
    %9 = vector.shape_cast %8 : vector<1x1x384xf32> to vector<1x384xf32>
    %10 = vector.broadcast %9 : vector<1x384xf32> to vector<32x384xf32>
    %11 = arith.addf %7, %10 : vector<32x384xf32>
    %12 = vector.extract_strided_slice %11 {offsets = [0, 0], sizes = [32, 128], strides = [1, 1]} : vector<32x384xf32> to vector<32x128xf32>
    %13 = vector.shape_cast %12 : vector<32x128xf32> to vector<4x8x128xf32>
    %14 = vector.extract_strided_slice %11 {offsets = [0, 128], sizes = [32, 128], strides = [1, 1]} : vector<32x384xf32> to vector<32x128xf32>
    %15 = vector.shape_cast %14 : vector<32x128xf32> to vector<4x8x128xf32>
    %16 = vector.extract_strided_slice %11 {offsets = [0, 256], sizes = [32, 128], strides = [1, 1]} : vector<32x384xf32> to vector<32x128xf32>
    %17 = vector.shape_cast %16 : vector<32x128xf32> to vector<4x8x128xf32>
    %18 = vector.extract_strided_slice %13 {offsets = [0, 0, 0], sizes = [4, 8, 32], strides = [1, 1, 1]} : vector<4x8x128xf32> to vector<4x8x32xf32>
    %19 = arith.truncf %18 : vector<4x8x32xf32> to vector<4x8x32xbf16>
    %20 = vector.extract_strided_slice %15 {offsets = [0, 0, 0], sizes = [4, 8, 32], strides = [1, 1, 1]} : vector<4x8x128xf32> to vector<4x8x32xf32>
    %21 = arith.truncf %20 : vector<4x8x32xf32> to vector<4x8x32xbf16>
    %22 = vector.extract_strided_slice %17 {offsets = [0, 0, 0], sizes = [4, 8, 32], strides = [1, 1, 1]} : vector<4x8x128xf32> to vector<4x8x32xf32>
    %23 = arith.truncf %22 : vector<4x8x32xf32> to vector<4x8x32xbf16>
    "tpu.trace_start"() <{level = 10 : i32, message = "bqd,bkd->bqk"}> : () -> ()
    %cst_8 = arith.constant dense<0.000000e+00> : vector<4x8x8xf32>
    %24 = tpu.matmul %19, %21, %cst_8 {dimension_numbers = #tpu.dot_dimension_numbers<[2], [2], [1], [1], [0, 0, 0, 1, 1, 1], [0], [0]>} : vector<4x8x32xbf16>, vector<4x8x32xbf16>, vector<4x8x8xf32> -> vector<4x8x8xf32>
    "tpu.trace_stop"() : () -> ()
    %cst_9 = arith.constant dense<0xFF800000> : vector<4x8xf32>
    %25 = vector.multi_reduction <maximumf>, %24, %cst_9 [2] : vector<4x8x8xf32> to vector<4x8xf32>
    %26 = vector.shape_cast %25 : vector<4x8xf32> to vector<4x8x1xf32>
    %27 = vector.broadcast %26 : vector<4x8x1xf32> to vector<4x8x8xf32>
    %28 = arith.subf %24, %27 : vector<4x8x8xf32>
    %29 = math.exp %28 : vector<4x8x8xf32>
    %cst_10 = arith.constant dense<0.000000e+00> : vector<4x8xf32>
    %30 = vector.multi_reduction <add>, %29, %cst_10 [2] : vector<4x8x8xf32> to vector<4x8xf32>
    %31 = vector.shape_cast %30 : vector<4x8xf32> to vector<4x8x1xf32>
    %32 = tpu.reciprocal %31 {approx = true} : vector<4x8x1xf32> -> vector<4x8x1xf32>
    %33 = vector.broadcast %32 : vector<4x8x1xf32> to vector<4x8x8xf32>
    %34 = arith.mulf %29, %33 : vector<4x8x8xf32>
    %35 = arith.truncf %34 : vector<4x8x8xf32> to vector<4x8x8xbf16>
    "tpu.trace_start"() <{level = 10 : i32, message = "bqk,bkd->bqd"}> : () -> ()
    %cst_11 = arith.constant dense<0.000000e+00> : vector<4x8x32xf32>
    %36 = tpu.matmul %35, %23, %cst_11 {dimension_numbers = #tpu.dot_dimension_numbers<[2], [1], [1], [2], [0, 0, 0, 1, 1, 2], [0], [0]>} : vector<4x8x8xbf16>, vector<4x8x32xbf16>, vector<4x8x32xf32> -> vector<4x8x32xf32>
    "tpu.trace_stop"() : () -> ()
    %37 = vector.shape_cast %36 : vector<4x8x32xf32> to vector<32x32xf32>
    %38 = arith.truncf %37 : vector<32x32xf32> to vector<32x32xbf16>
    %c0_12 = arith.constant 0 : index
    %c0_13 = arith.constant 0 : index
    %39 = vector.load %arg17[%c0_12, %c0_13] : memref<32x128xbf16, #tpu.memory_space<vmem>>, vector<32x32xbf16>
    tpu.vector_store %arg17[%c0_12, %c0_13], %38 {strides = array<i32>} : memref<32x128xbf16, #tpu.memory_space<vmem>>, vector<32x32xbf16>,
    %40 = vector.extract_strided_slice %13 {offsets = [0, 0, 32], sizes = [4, 8, 32], strides = [1, 1, 1]} : vector<4x8x128xf32> to vector<4x8x32xf32>
    %41 = arith.truncf %40 : vector<4x8x32xf32> to vector<4x8x32xbf16>
    %42 = vector.extract_strided_slice %15 {offsets = [0, 0, 32], sizes = [4, 8, 32], strides = [1, 1, 1]} : vector<4x8x128xf32> to vector<4x8x32xf32>
    %43 = arith.truncf %42 : vector<4x8x32xf32> to vector<4x8x32xbf16>
    %44 = vector.extract_strided_slice %17 {offsets = [0, 0, 32], sizes = [4, 8, 32], strides = [1, 1, 1]} : vector<4x8x128xf32> to vector<4x8x32xf32>
    %45 = arith.truncf %44 : vector<4x8x32xf32> to vector<4x8x32xbf16>
    "tpu.trace_start"() <{level = 10 : i32, message = "bqd,bkd->bqk"}> : () -> ()
    %cst_14 = arith.constant dense<0.000000e+00> : vector<4x8x8xf32>
    %46 = tpu.matmul %41, %43, %cst_14 {dimension_numbers = #tpu.dot_dimension_numbers<[2], [2], [1], [1], [0, 0, 0, 1, 1, 1], [0], [0]>} : vector<4x8x32xbf16>, vector<4x8x32xbf16>, vector<4x8x8xf32> -> vector<4x8x8xf32>
    "tpu.trace_stop"() : () -> ()
    %cst_15 = arith.constant dense<0xFF800000> : vector<4x8xf32>
    %47 = vector.multi_reduction <maximumf>, %46, %cst_15 [2] : vector<4x8x8xf32> to vector<4x8xf32>
    %48 = vector.shape_cast %47 : vector<4x8xf32> to vector<4x8x1xf32>
    %49 = vector.broadcast %48 : vector<4x8x1xf32> to vector<4x8x8xf32>
    %50 = arith.subf %46, %49 : vector<4x8x8xf32>
    %51 = math.exp %50 : vector<4x8x8xf32>
    %cst_16 = arith.constant dense<0.000000e+00> : vector<4x8xf32>
    %52 = vector.multi_reduction <add>, %51, %cst_16 [2] : vector<4x8x8xf32> to vector<4x8xf32>
    %53 = vector.shape_cast %52 : vector<4x8xf32> to vector<4x8x1xf32>
    %54 = tpu.reciprocal %53 {approx = true} : vector<4x8x1xf32> -> vector<4x8x1xf32>
    %55 = vector.broadcast %54 : vector<4x8x1xf32> to vector<4x8x8xf32>
    %56 = arith.mulf %51, %55 : vector<4x8x8xf32>
    %57 = arith.truncf %56 : vector<4x8x8xf32> to vector<4x8x8xbf16>
    "tpu.trace_start"() <{level = 10 : i32, message = "bqk,bkd->bqd"}> : () -> ()
    %cst_17 = arith.constant dense<0.000000e+00> : vector<4x8x32xf32>
    %58 = tpu.matmul %57, %45, %cst_17 {dimension_numbers = #tpu.dot_dimension_numbers<[2], [1], [1], [2], [0, 0, 0, 1, 1, 2], [0], [0]>} : vector<4x8x8xbf16>, vector<4x8x32xbf16>, vector<4x8x32xf32> -> vector<4x8x32xf32>
    "tpu.trace_stop"() : () -> ()
    %59 = vector.shape_cast %58 : vector<4x8x32xf32> to vector<32x32xf32>
    %60 = arith.truncf %59 : vector<32x32xf32> to vector<32x32xbf16>
    %c0_18 = arith.constant 0 : index
    %c32 = arith.constant 32 : index
    %61 = vector.load %arg17[%c0_18, %c32] : memref<32x128xbf16, #tpu.memory_space<vmem>>, vector<32x32xbf16>
    tpu.vector_store %arg17[%c0_18, %c32], %60 {strides = array<i32>} : memref<32x128xbf16, #tpu.memory_space<vmem>>, vector<32x32xbf16>,
    %62 = vector.extract_strided_slice %13 {offsets = [0, 0, 64], sizes = [4, 8, 32], strides = [1, 1, 1]} : vector<4x8x128xf32> to vector<4x8x32xf32>
    %63 = arith.truncf %62 : vector<4x8x32xf32> to vector<4x8x32xbf16>
    %64 = vector.extract_strided_slice %15 {offsets = [0, 0, 64], sizes = [4, 8, 32], strides = [1, 1, 1]} : vector<4x8x128xf32> to vector<4x8x32xf32>
    %65 = arith.truncf %64 : vector<4x8x32xf32> to vector<4x8x32xbf16>
    %66 = vector.extract_strided_slice %17 {offsets = [0, 0, 64], sizes = [4, 8, 32], strides = [1, 1, 1]} : vector<4x8x128xf32> to vector<4x8x32xf32>
    %67 = arith.truncf %66 : vector<4x8x32xf32> to vector<4x8x32xbf16>
    "tpu.trace_start"() <{level = 10 : i32, message = "bqd,bkd->bqk"}> : () -> ()
    %cst_19 = arith.constant dense<0.000000e+00> : vector<4x8x8xf32>
    %68 = tpu.matmul %63, %65, %cst_19 {dimension_numbers = #tpu.dot_dimension_numbers<[2], [2], [1], [1], [0, 0, 0, 1, 1, 1], [0], [0]>} : vector<4x8x32xbf16>, vector<4x8x32xbf16>, vector<4x8x8xf32> -> vector<4x8x8xf32>
    "tpu.trace_stop"() : () -> ()
    %cst_20 = arith.constant dense<0xFF800000> : vector<4x8xf32>
    %69 = vector.multi_reduction <maximumf>, %68, %cst_20 [2] : vector<4x8x8xf32> to vector<4x8xf32>
    %70 = vector.shape_cast %69 : vector<4x8xf32> to vector<4x8x1xf32>
    %71 = vector.broadcast %70 : vector<4x8x1xf32> to vector<4x8x8xf32>
    %72 = arith.subf %68, %71 : vector<4x8x8xf32>
    %73 = math.exp %72 : vector<4x8x8xf32>
    %cst_21 = arith.constant dense<0.000000e+00> : vector<4x8xf32>
    %74 = vector.multi_reduction <add>, %73, %cst_21 [2] : vector<4x8x8xf32> to vector<4x8xf32>
    %75 = vector.shape_cast %74 : vector<4x8xf32> to vector<4x8x1xf32>
    %76 = tpu.reciprocal %75 {approx = true} : vector<4x8x1xf32> -> vector<4x8x1xf32>
    %77 = vector.broadcast %76 : vector<4x8x1xf32> to vector<4x8x8xf32>
    %78 = arith.mulf %73, %77 : vector<4x8x8xf32>
    %79 = arith.truncf %78 : vector<4x8x8xf32> to vector<4x8x8xbf16>
    "tpu.trace_start"() <{level = 10 : i32, message = "bqk,bkd->bqd"}> : () -> ()
    %cst_22 = arith.constant dense<0.000000e+00> : vector<4x8x32xf32>
    %80 = tpu.matmul %79, %67, %cst_22 {dimension_numbers = #tpu.dot_dimension_numbers<[2], [1], [1], [2], [0, 0, 0, 1, 1, 2], [0], [0]>} : vector<4x8x8xbf16>, vector<4x8x32xbf16>, vector<4x8x32xf32> -> vector<4x8x32xf32>
    "tpu.trace_stop"() : () -> ()
    %81 = vector.shape_cast %80 : vector<4x8x32xf32> to vector<32x32xf32>
    %82 = arith.truncf %81 : vector<32x32xf32> to vector<32x32xbf16>
    %c0_23 = arith.constant 0 : index
    %c64 = arith.constant 64 : index
    %83 = vector.load %arg17[%c0_23, %c64] : memref<32x128xbf16, #tpu.memory_space<vmem>>, vector<32x32xbf16>
    tpu.vector_store %arg17[%c0_23, %c64], %82 {strides = array<i32>} : memref<32x128xbf16, #tpu.memory_space<vmem>>, vector<32x32xbf16>,
    %84 = vector.extract_strided_slice %13 {offsets = [0, 0, 96], sizes = [4, 8, 32], strides = [1, 1, 1]} : vector<4x8x128xf32> to vector<4x8x32xf32>
    %85 = arith.truncf %84 : vector<4x8x32xf32> to vector<4x8x32xbf16>
    %86 = vector.extract_strided_slice %15 {offsets = [0, 0, 96], sizes = [4, 8, 32], strides = [1, 1, 1]} : vector<4x8x128xf32> to vector<4x8x32xf32>
    %87 = arith.truncf %86 : vector<4x8x32xf32> to vector<4x8x32xbf16>
    %88 = vector.extract_strided_slice %17 {offsets = [0, 0, 96], sizes = [4, 8, 32], strides = [1, 1, 1]} : vector<4x8x128xf32> to vector<4x8x32xf32>
    %89 = arith.truncf %88 : vector<4x8x32xf32> to vector<4x8x32xbf16>
    "tpu.trace_start"() <{level = 10 : i32, message = "bqd,bkd->bqk"}> : () -> ()
    %cst_24 = arith.constant dense<0.000000e+00> : vector<4x8x8xf32>
    %90 = tpu.matmul %85, %87, %cst_24 {dimension_numbers = #tpu.dot_dimension_numbers<[2], [2], [1], [1], [0, 0, 0, 1, 1, 1], [0], [0]>} : vector<4x8x32xbf16>, vector<4x8x32xbf16>, vector<4x8x8xf32> -> vector<4x8x8xf32>
    "tpu.trace_stop"() : () -> ()
    %cst_25 = arith.constant dense<0xFF800000> : vector<4x8xf32>
    %91 = vector.multi_reduction <maximumf>, %90, %cst_25 [2] : vector<4x8x8xf32> to vector<4x8xf32>
    %92 = vector.shape_cast %91 : vector<4x8xf32> to vector<4x8x1xf32>
    %93 = vector.broadcast %92 : vector<4x8x1xf32> to vector<4x8x8xf32>
    %94 = arith.subf %90, %93 : vector<4x8x8xf32>
    %95 = math.exp %94 : vector<4x8x8xf32>
    %cst_26 = arith.constant dense<0.000000e+00> : vector<4x8xf32>
    %96 = vector.multi_reduction <add>, %95, %cst_26 [2] : vector<4x8x8xf32> to vector<4x8xf32>
    %97 = vector.shape_cast %96 : vector<4x8xf32> to vector<4x8x1xf32>
    %98 = tpu.reciprocal %97 {approx = true} : vector<4x8x1xf32> -> vector<4x8x1xf32>
    %99 = vector.broadcast %98 : vector<4x8x1xf32> to vector<4x8x8xf32>
    %100 = arith.mulf %95, %99 : vector<4x8x8xf32>
    %101 = arith.truncf %100 : vector<4x8x8xf32> to vector<4x8x8xbf16>
    "tpu.trace_start"() <{level = 10 : i32, message = "bqk,bkd->bqd"}> : () -> ()
    %cst_27 = arith.constant dense<0.000000e+00> : vector<4x8x32xf32>
    %102 = tpu.matmul %101, %89, %cst_27 {dimension_numbers = #tpu.dot_dimension_numbers<[2], [1], [1], [2], [0, 0, 0, 1, 1, 2], [0], [0]>} : vector<4x8x8xbf16>, vector<4x8x32xbf16>, vector<4x8x32xf32> -> vector<4x8x32xf32>
    "tpu.trace_stop"() : () -> ()
    %103 = vector.shape_cast %102 : vector<4x8x32xf32> to vector<32x32xf32>
    %104 = arith.truncf %103 : vector<32x32xf32> to vector<32x32xbf16>
    %c0_28 = arith.constant 0 : index
    %c96 = arith.constant 96 : index
    %105 = vector.load %arg17[%c0_28, %c96] : memref<32x128xbf16, #tpu.memory_space<vmem>>, vector<32x32xbf16>
    tpu.vector_store %arg17[%c0_28, %c96], %104 {strides = array<i32>} : memref<32x128xbf16, #tpu.memory_space<vmem>>, vector<32x32xbf16>,
    %c0_29 = arith.constant 0 : index
    %c0_30 = arith.constant 0 : index
    %106 = vector.load %arg17[%c0_29, %c0_30] : memref<32x128xbf16, #tpu.memory_space<vmem>>, vector<32x128xbf16>
    %c0_31 = arith.constant 0 : index
    %c0_32 = arith.constant 0 : index
    %c0_33 = arith.constant 0 : index
    %107 = vector.load %arg5[%c0_31, %c0_32, %c0_33] : memref<1x128x128xbf16, #tpu.memory_space<vmem>>, vector<1x128x128xbf16>
    %108 = vector.shape_cast %107 : vector<1x128x128xbf16> to vector<128x128xbf16>
    %cst_34 = arith.constant dense<0.000000e+00> : vector<32x128xf32>
    %109 = tpu.matmul %106, %108, %cst_34 {dimension_numbers = #tpu.dot_dimension_numbers<[1], [0], [0], [1], [0, 0, 1, 1], [], []>} : vector<32x128xbf16>, vector<128x128xbf16>, vector<32x128xf32> -> vector<32x128xf32>
    %c0_35 = arith.constant 0 : index
    %c0_36 = arith.constant 0 : index
    %c0_37 = arith.constant 0 : index
    %110 = vector.load %arg6[%c0_35, %c0_36, %c0_37] : memref<1x1x128xf32, #tpu.memory_space<vmem>>, vector<1x1x128xf32>
    %111 = vector.shape_cast %110 : vector<1x1x128xf32> to vector<1x128xf32>
    %112 = vector.broadcast %111 : vector<1x128xf32> to vector<32x128xf32>
    %113 = arith.addf %109, %112 : vector<32x128xf32>
    %114 = arith.addf %113, %3 : vector<32x128xf32>
    %cst_38 = arith.constant dense<0.000000e+00> : vector<32xf32>
    %115 = vector.multi_reduction <add>, %114, %cst_38 [1] : vector<32x128xf32> to vector<32xf32>
    %116 = vector.shape_cast %115 : vector<32xf32> to vector<32x1xf32>
    %cst_39 = arith.constant 1.280000e+02 : f32
    %117 = vector.broadcast %cst_39 : f32 to vector<32x1xf32>
    %118 = arith.divf %116, %117 : vector<32x1xf32>
    %119 = vector.broadcast %118 : vector<32x1xf32> to vector<32x128xf32>
    %120 = arith.subf %114, %119 : vector<32x128xf32>
    %121 = arith.mulf %120, %120 : vector<32x128xf32>
    %cst_40 = arith.constant dense<0.000000e+00> : vector<32xf32>
    %122 = vector.multi_reduction <add>, %121, %cst_40 [1] : vector<32x128xf32> to vector<32xf32>
    %123 = vector.shape_cast %122 : vector<32xf32> to vector<32x1xf32>
    %cst_41 = arith.constant 1.280000e+02 : f32
    %124 = vector.broadcast %cst_41 : f32 to vector<32x1xf32>
    %125 = arith.divf %123, %124 : vector<32x1xf32>
    %126 = vector.broadcast %118 : vector<32x1xf32> to vector<32x128xf32>
    %127 = arith.subf %114, %126 : vector<32x128xf32>
    %cst_42 = arith.constant 9.99999974E-6 : f32
    %128 = vector.broadcast %cst_42 : f32 to vector<32x1xf32>
    %129 = arith.addf %125, %128 : vector<32x1xf32>
    %130 = math.rsqrt %129 : vector<32x1xf32>
    %131 = vector.broadcast %130 : vector<32x1xf32> to vector<32x128xf32>
    %132 = arith.mulf %127, %131 : vector<32x128xf32>
    %c0_43 = arith.constant 0 : index
    %c0_44 = arith.constant 0 : index
    %c0_45 = arith.constant 0 : index
    %133 = vector.load %arg7[%c0_43, %c0_44, %c0_45] : memref<1x1x128xf32, #tpu.memory_space<vmem>>, vector<1x1x128xf32>
    %134 = vector.shape_cast %133 : vector<1x1x128xf32> to vector<1x128xf32>
    %135 = vector.broadcast %134 : vector<1x128xf32> to vector<32x128xf32>
    %136 = arith.mulf %132, %135 : vector<32x128xf32>
    %c0_46 = arith.constant 0 : index
    %c0_47 = arith.constant 0 : index
    %c0_48 = arith.constant 0 : index
    %137 = vector.load %arg8[%c0_46, %c0_47, %c0_48] : memref<1x1x128xf32, #tpu.memory_space<vmem>>, vector<1x1x128xf32>
    %138 = vector.shape_cast %137 : vector<1x1x128xf32> to vector<1x128xf32>
    %139 = vector.broadcast %138 : vector<1x128xf32> to vector<32x128xf32>
    %140 = arith.addf %136, %139 : vector<32x128xf32>
    %141 = arith.truncf %140 : vector<32x128xf32> to vector<32x128xbf16>
    %c0_49 = arith.constant 0 : index
    %c0_50 = arith.constant 0 : index
    %c0_51 = arith.constant 0 : index
    %142 = vector.load %arg9[%c0_49, %c0_50, %c0_51] : memref<1x128x256xbf16, #tpu.memory_space<vmem>>, vector<1x128x256xbf16>
    %143 = vector.shape_cast %142 : vector<1x128x256xbf16> to vector<128x256xbf16>
    %cst_52 = arith.constant dense<0.000000e+00> : vector<32x256xf32>
    %144 = tpu.matmul %141, %143, %cst_52 {dimension_numbers = #tpu.dot_dimension_numbers<[1], [0], [0], [1], [0, 0, 1, 1], [], []>} : vector<32x128xbf16>, vector<128x256xbf16>, vector<32x256xf32> -> vector<32x256xf32>
    %c0_53 = arith.constant 0 : index
    %c0_54 = arith.constant 0 : index
    %c0_55 = arith.constant 0 : index
    %145 = vector.load %arg10[%c0_53, %c0_54, %c0_55] : memref<1x1x256xf32, #tpu.memory_space<vmem>>, vector<1x1x256xf32>
    %146 = vector.shape_cast %145 : vector<1x1x256xf32> to vector<1x256xf32>
    %147 = vector.broadcast %146 : vector<1x256xf32> to vector<32x256xf32>
    %148 = arith.addf %144, %147 : vector<32x256xf32>
    %cst_56 = arith.constant 0.000000e+00 : f32
    %149 = vector.broadcast %cst_56 : f32 to vector<32x256xf32>
    %150 = arith.maximumf %148, %149 : vector<32x256xf32>
    %151 = arith.truncf %150 : vector<32x256xf32> to vector<32x256xbf16>
    %c0_57 = arith.constant 0 : index
    %c0_58 = arith.constant 0 : index
    %c0_59 = arith.constant 0 : index
    %152 = vector.load %arg11[%c0_57, %c0_58, %c0_59] : memref<1x256x128xbf16, #tpu.memory_space<vmem>>, vector<1x256x128xbf16>
    %153 = vector.shape_cast %152 : vector<1x256x128xbf16> to vector<256x128xbf16>
    %cst_60 = arith.constant dense<0.000000e+00> : vector<32x128xf32>
    %154 = tpu.matmul %151, %153, %cst_60 {dimension_numbers = #tpu.dot_dimension_numbers<[1], [0], [0], [1], [0, 0, 1, 1], [], []>} : vector<32x256xbf16>, vector<256x128xbf16>, vector<32x128xf32> -> vector<32x128xf32>
    %c0_61 = arith.constant 0 : index
    %c0_62 = arith.constant 0 : index
    %c0_63 = arith.constant 0 : index
    %155 = vector.load %arg12[%c0_61, %c0_62, %c0_63] : memref<1x1x128xf32, #tpu.memory_space<vmem>>, vector<1x1x128xf32>
    %156 = vector.shape_cast %155 : vector<1x1x128xf32> to vector<1x128xf32>
    %157 = vector.broadcast %156 : vector<1x128xf32> to vector<32x128xf32>
    %158 = arith.addf %154, %157 : vector<32x128xf32>
    %159 = arith.addf %158, %140 : vector<32x128xf32>
    %cst_64 = arith.constant dense<0.000000e+00> : vector<32xf32>
    %160 = vector.multi_reduction <add>, %159, %cst_64 [1] : vector<32x128xf32> to vector<32xf32>
    %161 = vector.shape_cast %160 : vector<32xf32> to vector<32x1xf32>
    %cst_65 = arith.constant 1.280000e+02 : f32
    %162 = vector.broadcast %cst_65 : f32 to vector<32x1xf32>
    %163 = arith.divf %161, %162 : vector<32x1xf32>
    %164 = vector.broadcast %163 : vector<32x1xf32> to vector<32x128xf32>
    %165 = arith.subf %159, %164 : vector<32x128xf32>
    %166 = arith.mulf %165, %165 : vector<32x128xf32>
    %cst_66 = arith.constant dense<0.000000e+00> : vector<32xf32>
    %167 = vector.multi_reduction <add>, %166, %cst_66 [1] : vector<32x128xf32> to vector<32xf32>
    %168 = vector.shape_cast %167 : vector<32xf32> to vector<32x1xf32>
    %cst_67 = arith.constant 1.280000e+02 : f32
    %169 = vector.broadcast %cst_67 : f32 to vector<32x1xf32>
    %170 = arith.divf %168, %169 : vector<32x1xf32>
    %171 = vector.broadcast %163 : vector<32x1xf32> to vector<32x128xf32>
    %172 = arith.subf %159, %171 : vector<32x128xf32>
    %cst_68 = arith.constant 9.99999974E-6 : f32
    %173 = vector.broadcast %cst_68 : f32 to vector<32x1xf32>
    %174 = arith.addf %170, %173 : vector<32x1xf32>
    %175 = math.rsqrt %174 : vector<32x1xf32>
    %176 = vector.broadcast %175 : vector<32x1xf32> to vector<32x128xf32>
    %177 = arith.mulf %172, %176 : vector<32x128xf32>
    %c0_69 = arith.constant 0 : index
    %c0_70 = arith.constant 0 : index
    %c0_71 = arith.constant 0 : index
    %178 = vector.load %arg13[%c0_69, %c0_70, %c0_71] : memref<1x1x128xf32, #tpu.memory_space<vmem>>, vector<1x1x128xf32>
    %179 = vector.shape_cast %178 : vector<1x1x128xf32> to vector<1x128xf32>
    %180 = vector.broadcast %179 : vector<1x128xf32> to vector<32x128xf32>
    %181 = arith.mulf %177, %180 : vector<32x128xf32>
    %c0_72 = arith.constant 0 : index
    %c0_73 = arith.constant 0 : index
    %c0_74 = arith.constant 0 : index
    %182 = vector.load %arg14[%c0_72, %c0_73, %c0_74] : memref<1x1x128xf32, #tpu.memory_space<vmem>>, vector<1x1x128xf32>
    %183 = vector.shape_cast %182 : vector<1x1x128xf32> to vector<1x128xf32>
    %184 = vector.broadcast %183 : vector<1x128xf32> to vector<32x128xf32>
    %185 = arith.addf %181, %184 : vector<32x128xf32>
    %c0_75 = arith.constant 0 : index
    %c0_76 = arith.constant 0 : index
    %186 = vector.load %arg16[%c0_75, %c0_76] : memref<32x128xf32, #tpu.memory_space<vmem>>, vector<32x128xf32>
    tpu.vector_store %arg16[%c0_75, %c0_76], %185 {strides = array<i32>} : memref<32x128xf32, #tpu.memory_space<vmem>>, vector<32x128xf32>,
    %c1_i32 = arith.constant 1 : i32
    %187 = arith.cmpi eq, %arg1, %c1_i32 : i32
    %188 = arith.extui %187 : i1 to i32
    %c0_i32_77 = arith.constant 0 : i32
    %189 = arith.cmpi ne, %188, %c0_i32_77 : i32
    scf.if %189 {
      %190 = vector.shape_cast %185 : vector<32x128xf32> to vector<4x8x128xf32>
      %c0_78 = arith.constant 0 : index
      %c0_79 = arith.constant 0 : index
      %c0_80 = arith.constant 0 : index
      %191 = vector.load %arg15[%c0_78, %c0_79, %c0_80] : memref<4x8x128xf32, #tpu.memory_space<vmem>>, vector<4x8x128xf32>
      tpu.vector_store %arg15[%c0_78, %c0_79, %c0_80], %190 {strides = array<i32>} : memref<4x8x128xf32, #tpu.memory_space<vmem>>, vector<4x8x128xf32>,
    } else {
    }
    return
  }
  func.func @transform_0(%arg0: i32, %arg1: i32) -> (i32, i32, i32) {
    %c0_i32 = arith.constant 0 : i32
    %c0_i32_0 = arith.constant 0 : i32
    %c0_i32_1 = arith.constant 0 : i32
    return %arg0, %c0_i32, %c0_i32_0 : i32, i32, i32
  }
  func.func @transform_1(%arg0: i32, %arg1: i32) -> (i32, i32, i32) {
    %c0_i32 = arith.constant 0 : i32
    %c0_i32_0 = arith.constant 0 : i32
    %c0_i32_1 = arith.constant 0 : i32
    return %arg1, %c0_i32, %c0_i32_0 : i32, i32, i32
  }
  func.func @transform_2(%arg0: i32, %arg1: i32) -> (i32, i32, i32) {
    %c0_i32 = arith.constant 0 : i32
    %c0_i32_0 = arith.constant 0 : i32
    %c0_i32_1 = arith.constant 0 : i32
    return %arg1, %c0_i32, %c0_i32_0 : i32, i32, i32
  }
  func.func @transform_3(%arg0: i32, %arg1: i32) -> (i32, i32, i32) {
    %c0_i32 = arith.constant 0 : i32
    %c0_i32_0 = arith.constant 0 : i32
    %c0_i32_1 = arith.constant 0 : i32
    return %arg1, %c0_i32, %c0_i32_0 : i32, i32, i32
  }
  func.func @transform_4(%arg0: i32, %arg1: i32) -> (i32, i32, i32) {
    %c0_i32 = arith.constant 0 : i32
    %c0_i32_0 = arith.constant 0 : i32
    %c0_i32_1 = arith.constant 0 : i32
    return %arg1, %c0_i32, %c0_i32_0 : i32, i32, i32
  }
  func.func @transform_5(%arg0: i32, %arg1: i32) -> (i32, i32, i32) {
    %c0_i32 = arith.constant 0 : i32
    %c0_i32_0 = arith.constant 0 : i32
    %c0_i32_1 = arith.constant 0 : i32
    return %arg1, %c0_i32, %c0_i32_0 : i32, i32, i32
  }
  func.func @transform_6(%arg0: i32, %arg1: i32) -> (i32, i32, i32) {
    %c0_i32 = arith.constant 0 : i32
    %c0_i32_0 = arith.constant 0 : i32
    %c0_i32_1 = arith.constant 0 : i32
    return %arg1, %c0_i32, %c0_i32_0 : i32, i32, i32
  }
  func.func @transform_7(%arg0: i32, %arg1: i32) -> (i32, i32, i32) {
    %c0_i32 = arith.constant 0 : i32
    %c0_i32_0 = arith.constant 0 : i32
    %c0_i32_1 = arith.constant 0 : i32
    return %arg1, %c0_i32, %c0_i32_0 : i32, i32, i32
  }
  func.func @transform_8(%arg0: i32, %arg1: i32) -> (i32, i32, i32) {
    %c0_i32 = arith.constant 0 : i32
    %c0_i32_0 = arith.constant 0 : i32
    %c0_i32_1 = arith.constant 0 : i32
    return %arg1, %c0_i32, %c0_i32_0 : i32, i32, i32
  }
  func.func @transform_9(%arg0: i32, %arg1: i32) -> (i32, i32, i32) {
    %c0_i32 = arith.constant 0 : i32
    %c0_i32_0 = arith.constant 0 : i32
    %c0_i32_1 = arith.constant 0 : i32
    return %arg1, %c0_i32, %c0_i32_0 : i32, i32, i32
  }
  func.func @transform_10(%arg0: i32, %arg1: i32) -> (i32, i32, i32) {
    %c0_i32 = arith.constant 0 : i32
    %c0_i32_0 = arith.constant 0 : i32
    %c0_i32_1 = arith.constant 0 : i32
    return %arg1, %c0_i32, %c0_i32_0 : i32, i32, i32
  }
  func.func @transform_11(%arg0: i32, %arg1: i32) -> (i32, i32, i32) {
    %c0_i32 = arith.constant 0 : i32
    %c0_i32_0 = arith.constant 0 : i32
    %c0_i32_1 = arith.constant 0 : i32
    return %arg1, %c0_i32, %c0_i32_0 : i32, i32, i32
  }
  func.func @transform_12(%arg0: i32, %arg1: i32) -> (i32, i32, i32) {
    %c0_i32 = arith.constant 0 : i32
    %c0_i32_0 = arith.constant 0 : i32
    %c0_i32_1 = arith.constant 0 : i32
    return %arg1, %c0_i32, %c0_i32_0 : i32, i32, i32
  }
  func.func @transform_13(%arg0: i32, %arg1: i32) -> (i32, i32, i32) {
    %c0_i32 = arith.constant 0 : i32
    %c0_i32_0 = arith.constant 0 : i32
    %c0_i32_1 = arith.constant 0 : i32
    return %arg0, %c0_i32, %c0_i32_0 : i32, i32, i32
  }
}

</mosaic_0001>

<bundles_post_ra>
// kernel: tpu_custom_call.1
= control target key start
LH: loop header
LB: loop body
LE: loop exit
PB: predicated region body
PF: predicated region fallthrough
CT: control target
= control target key end

     0   :  { %s5623_s0 = inlined_call_operand.hbm [shape: bf16[4,8,128], index: 0, kind: input, shape index: {}]   ;;  %s5624_s1 = inlined_call_operand.hbm [shape: bf16[2,128,384], index: 1, kind: input, shape index: {}]   ;;  %s5625_s2 = inlined_call_operand.vmem [shape: f32[2,1,384], index: 2, kind: input, shape index: {}]   ;;  %s5626_s3 = inlined_call_operand.hbm [shape: bf16[2,128,128], index: 3, kind: input, shape index: {}]   ;;  %s5627_s4 = inlined_call_operand.vmem [shape: f32[2,1,128], index: 4, kind: input, shape index: {}]   ;;  %s5628_s5 = inlined_call_operand.vmem [shape: f32[2,1,128], index: 5, kind: input, shape index: {}]   ;;  %s5629_s6 = inlined_call_operand.vmem [shape: f32[2,1,128], index: 6, kind: input, shape index: {}]   ;;  %s5630_s7 = inlined_call_operand.hbm [shape: bf16[2,128,256], index: 7, kind: input, shape index: {}]   ;;  %s5631_s8 = inlined_call_operand.vmem [shape: f32[2,1,256], index: 8, kind: input, shape index: {}]   ;;  %s5632_s9 = inlined_call_operand.hbm [shape: bf16[2,256,128], index: 9, kind: input, shape index: {}]   ;;  %s5633_s10 = inlined_call_operand.vmem [shape: f32[2,1,128], index: 10, kind: input, shape index: {}]   ;;  %s5634_s11 = inlined_call_operand.vmem [shape: f32[2,1,128], index: 11, kind: input, shape index: {}]   ;;  %s5635_s12 = inlined_call_operand.vmem [shape: f32[2,1,128], index: 12, kind: input, shape index: {}]   ;;  %s5636_s13 = inlined_call_operand.hbm [shape: f32[4,8,128], index: 13, kind: output, shape index: {}]  }
   0x1   :  { %5650 = sst [smem:[#allocation24_spill]] %s5623_s0 }
   0x2   :  { %5651 = sst [smem:[#allocation25_spill]] %s5624_s1 }
   0x3   :  { %5652 = sst [smem:[#allocation26_spill]] %s5625_s2 }
   0x4   :  { %5653 = sst [smem:[#allocation27_spill]] %s5626_s3 }
   0x5   :  { %5654 = sst [smem:[#allocation28_spill]] %s5630_s7 }
   0x6   :  { %5655 = sst [smem:[#allocation29_spill]] %s5631_s8 }
   0x7   :  { %5656 = sst [smem:[#allocation30_spill]] %s5632_s9 }
   0x8   :  { %5657 = sst [smem:[#allocation31_spill]] %s5633_s10 }
   0x9   :  { %5658 = sst [smem:[#allocation32_spill]] %s5634_s11 }
   0xa   :  { %5659 = sst [smem:[#allocation33_spill]] %s5635_s12 }
   0xb   :  { %5660 = sst [smem:[#allocation34_spill]] %s5636_s13 }
   0xc   :  { %18 = vsyncpa [#allocation5], 0 }
   0xd   :  { %19 = vsyncpa [#allocation8], 0 }
   0xe   :  { %21 = vsyncpa [#allocation8 + $0x1], 0 }
   0xf   :  { %22 = vsyncpa [#allocation11], 0 }
  0x10   :  { %24 = vsyncpa [#allocation11 + $0x1], 0 }
  0x11   :  { %25 = vsyncpa [#allocation6], 0  ;;  %s4773_s25 = smov 0   ;;  %s4775_s26 = smov 0  }
  0x12   :  { %s4777_s27 = smov 0   ;;  %s4779_s28 = smov 0  }
  0x13   :  { %s4781_s29 = smov 0   ;;  %s4783_s30 = smov 0  }
  0x14 LB: > { %5661 = sst [smem:[#allocation18_spill]] %s4665_s26  ;;  %s40_s14 = sadd.s32 1, %s4677_s29  ;;  %s4681_s30 = sphi %s4783_s30, %s31_s30   ;;  %s4677_s29 = sphi %s4781_s29, %s5702_s29   ;;  %s4673_s28 = sphi %s4779_s28, %s5701_s28   ;;  %s4669_s27 = sphi %s4777_s27, %s5700_s27   ;;  %s4665_s26 = sphi %s4775_s26, %s5699_s26   ;;  %s4661_s25 = sphi %s4773_s25, %s5698_s25  }
  0x15   : > { %5662 = sst [smem:[#allocation19_spill]] %s4669_s27  ;;  %s76_s15 = sadd.s32 1, %s4669_s27 }
  0x16   : > { %5663 = sst [smem:[#allocation20_spill]] %s4677_s29  ;;  %p41_p0 = scmp.ge.s32.totalorder %s40_s14, 2 }
  0x17   : > { %5664 = sst [smem:[#allocation21_spill]] %s4681_s30  ;;  %p83_p1 = scmp.ne.s32.totalorder %s4669_s27, %s4665_s26 }
  0x18   : > { %p84_p2 = scmp.eq.s32.totalorder %s4681_s30, 0  ;;  %s5704_s14 = smov (%p41_p0, %s40_s14), 0 }
  0x19   : > { %5665 = sst [smem:[#allocation22_spill]] %s5704_s14  ;;  %p4213_p4 = scmp.lt.s32.totalorder %s4681_s30, 2 }
  0x1a   : > { %p85_p3 = por %p84_p2, %p83_p1  ;;  %s73_s16 = ssub.s32 %s4677_s29, %s5704_s14 }
  0x1b   : > { %p74_p5 = scmp.eq.s32.totalorder %s73_s16, 0  ;;  %s4815_s18 = sand.u32 1, %s4669_s27  }
  0x1c   : > { %s4176_s19 = smul.u32 3072, %s4677_s29  ;;  %s5667_s1 = sld [smem:[#allocation25_spill]] }
  0x1d   : > { %s4819_s20 = scalar_select %p74_p5, %s4669_s27, %s76_s15  }
  0x1e   : > { %s4175_s21 = smul.u32 192, %s4815_s18  ;;  %p4827_p6 = pnand %p4213_p4, %p85_p3 }
  0x1f   : > { %5666 = sst [smem:[#allocation23_spill]] %s4819_s20  ;;  %s5669_s15 = sand.u32 1, %s4681_s30  }
  0x20   : > { %s5668_s14 = scalar_select %p4827_p6, 1, 0 }
  0x21   : > { %s445_s16 = scalar_lea.vmem [#allocation7], %s4175_s21  ;;  %s4835_s20 = scalar_lea.sflag [#allocation8], %s5669_s15 }
  0x22   : > { %s4825_s24 = scalar_lea.hbm %s5667_s1, %s4176_s19  ;;  %s452_s17 = sshll.u32 %s445_s16, 4  ;;  %s4831_s17 = int_to_ptr.vmem [resolvable:$true] %s452_s17 }
  0x23   : > { %s4445_s27 = scalar_lea.hbm %s4825_s24, 3072  ;;  %p4841_p8 = pneg %p4827_p6 }
  0x24   : > { %p4446_p7 = scmp.ne.s32.totalorder %s4825_s24, %s4445_s27  ;;  %s4450_s21 = scalar_lea.hbm %s5667_s1, 6144 }
  0x25   : > { %s5670_s19 = scalar_select %p4841_p8, 1, 0 }
  0x26   : > { %p4448_p9 = pnand %p4841_p8, %p4446_p7  ;;  %p4451_p11 = scmp.lt.u32.totalorder %s4825_s24, %s5667_s1 }
  0x27   : > { %p4452_p12 = scmp.lt.u32.totalorder %s4450_s21, %s4445_s27  ;;  %p4454_p0 = scmp.lt.u32.totalorder %s4445_s27, %s4825_s24 }
  0x28   : > { %p4449_p10 = pneg %p4448_p9 }
  0x29   : > { %p4453_p13 = por %p4452_p12, %p4451_p11 }
  0x2b   : > { %p4455_p1 = por %p4454_p0, %p4453_p13 }
  0x2d   : > { %p4456_p2 = pnand %p4455_p1, %p4449_p10 }
  0x2f   : > { %4459 = shalt.err (!%p4456_p2)
}
  0x30   : > { %s4460_s15 = scalar_lea.vmem %s4831_s17, 3072  ;;  %s4683_s22 = smov [#allocation7]  }
  0x31   : > { %p4461_p3 = scmp.ne.s32.totalorder %s4831_s17, %s4460_s15  ;;  %s4465_s23 = sshll.u32 %s4683_s22, 4  ;;  %s4466_s23 = int_to_ptr.vmem [resolvable:$false] %s4465_s23 }
  0x32   : > { %s4467_s13 = scalar_lea.vmem %s4466_s23, 6144  ;;  %p4468_p7 = scmp.lt.s32.totalorder %s4831_s17, %s4466_s23 }
  0x33   : > { %p4463_p4 = pnand %p4461_p3, %p4841_p8  ;;  %p4469_p9 = scmp.lt.s32.totalorder %s4467_s13, %s4460_s15 }
  0x35   : > { %p4464_p5 = pneg %p4463_p4  ;;  %p4470_p11 = por %p4469_p9, %p4468_p7 }
  0x37   : > { %p4471_p12 = pnand %p4470_p11, %p4464_p5 }
  0x39   : > { %4474 = shalt.err (!%p4471_p12)
}
  0x3a   : > { %s4684_s27 = smov 192   ;;  %s4685_s21 = smov 12  }
  0x3b   : > { %4202 = dma.hbm_to_vmem [thread:$0]  (!%p4827_p6), %s4825_s24, 3072, %s4831_s17, %s4835_s20, %s4684_s27, %s4684_s27, %s4685_s21  }
  0x3c   : > { %s3699_s16 = sshll.u32 %s4815_s18, 7  ;;  %s3820_s22 = sshll.u32 %s4677_s29, 11 }
  0x3d   : > { %s5671_s7 = sld [smem:[#allocation28_spill]]  ;;  %s512_s1 = scalar_lea.vmem [#allocation10], %s3699_s16 }
  0x3e   : > { %s519_s12 = sshll.u32 %s512_s1, 4  ;;  %s5672_s11 = sand.u32 1, %s4681_s30   ;;  %s4876_s12 = int_to_ptr.vmem [resolvable:$true] %s519_s12 }
  0x3f   : > { %s4880_s10 = scalar_lea.sflag [#allocation11], %s5672_s11 }
  0x43   : > { %s4872_s13 = scalar_lea.hbm %s5671_s7, %s3820_s22  ;;  %s4480_s21 = scalar_lea.hbm %s5671_s7, 4096 }
  0x44   : > { %s4475_s17 = scalar_lea.hbm %s4872_s13, 2048  ;;  %p4481_p1 = scmp.lt.u32.totalorder %s4872_s13, %s5671_s7 }
  0x45   : > { %p4476_p10 = scmp.ne.s32.totalorder %s4872_s13, %s4475_s17  ;;  %p4482_p2 = scmp.lt.u32.totalorder %s4480_s21, %s4475_s17 }
  0x46   : > { %p4484_p4 = scmp.lt.u32.totalorder %s4475_s17, %s4872_s13 }
  0x47   : > { %p4478_p13 = pnand %p4476_p10, %p4841_p8  ;;  %p4483_p3 = por %p4482_p2, %p4481_p1 }
  0x49   : > { %p4479_p0 = pneg %p4478_p13  ;;  %p4485_p5 = por %p4484_p4, %p4483_p3 }
  0x4b   : > { %p4486_p7 = pnand %p4485_p5, %p4479_p0 }
  0x4d   : > { %4489 = shalt.err (!%p4486_p7)
}
  0x4e   : > { %s4490_s1 = scalar_lea.vmem %s4876_s12, 2048  ;;  %s4686_s11 = smov [#allocation10]  }
  0x4f   : > { %p4491_p9 = scmp.ne.s32.totalorder %s4876_s12, %s4490_s1  ;;  %s4495_s24 = sshll.u32 %s4686_s11, 4  ;;  %s4496_s24 = int_to_ptr.vmem [resolvable:$false] %s4495_s24 }
  0x50   : > { %s4497_s27 = scalar_lea.vmem %s4496_s24, 4096  ;;  %p4498_p10 = scmp.lt.s32.totalorder %s4876_s12, %s4496_s24 }
  0x51   : > { %p4493_p11 = pnand %p4491_p9, %p4841_p8  ;;  %p4499_p13 = scmp.lt.s32.totalorder %s4497_s27, %s4490_s1 }
  0x53   : > { %p4494_p12 = pneg %p4493_p11  ;;  %p4500_p1 = por %p4499_p13, %p4498_p10 }
  0x55   : > { %p4501_p2 = pnand %p4500_p1, %p4494_p12 }
  0x57   : > { %4504 = shalt.err (!%p4501_p2)
}
  0x58   : > { %s4687_s17 = smov 128   ;;  %s4688_s21 = smov 8  }
  0x59   : > { %4208 = dma.hbm_to_vmem [thread:$0]  (!%p4827_p6), %s4872_s13, 2048, %s4876_s12, %s4880_s10, %s4687_s17, %s4687_s17, %s4688_s21  }
  0x5a   : > { %s5673_s9 = sld [smem:[#allocation30_spill]]  ;;  %s540_s11 = scalar_lea.vmem [#allocation12], %s3699_s16 }
  0x5b   : > { %s547_s24 = sshll.u32 %s540_s11, 4  ;;  %s4916_s27 = sadd.s32 4294967295, %s4681_s30   ;;  %s4913_s24 = int_to_ptr.vmem [resolvable:$true] %s547_s24 }
  0x5c   : > { %p89_p0 = scmp.ne.s32.totalorder %s4665_s26, %s4661_s25  ;;  %p5642_p3 = scmp.eq.s32.totalorder %s4916_s27, 0 }
  0x5d   : > { %p3692_p4 = scmp.ge.s32.totalorder %s4681_s30, 1  ;;  %p412_p5 = scmp.lt.s32.totalorder %s4681_s30, 3 }
  0x5e   : > { %p4925_p7 = por %p5642_p3, %p89_p0  ;;  %s4689_s16 = smov [#allocation4]  }
  0x5f   : > { %p4929_p9 = pnand %p3692_p4, %p412_p5  ;;  %s427_s13 = sshll.u32 %s4689_s16, 4  ;;  %s4933_s13 = int_to_ptr.vmem [resolvable:$true] %s427_s13 }
  0x60   : > { %s4909_s1 = scalar_lea.hbm %s5673_s9, %s3820_s22  ;;  %s3696_s25 = sshll.u32 %s4815_s18, 6 }
  0x61   : > { %s5674_s12 = scalar_select %p4925_p7, 1, 0 }
  0x62   : > { %s5675_s22 = scalar_select %p4929_p9, 1, 0 }
  0x63   : > { %p4195_p11 = pneg %p4929_p9  ;;  %s3819_s17 = sshll.u32 %s4677_s29, 10 }
  0x64   : > { %s5677_s3 = sld [smem:[#allocation27_spill]]  ;;  %s473_s7 = scalar_lea.vmem [#allocation9], %s3696_s25 }
  0x65   : > { %p4941_p12 = pnand %p4195_p11, %p5642_p3  ;;  %s480_s30 = sshll.u32 %s473_s7, 4  ;;  %s4950_s30 = int_to_ptr.vmem [resolvable:$true] %s480_s30 }
  0x66   : > { %s5678_s0 = sld [smem:[#allocation24_spill]] }
  0x67   : > { %p4507_p13 = pneg %p4941_p12 }
  0x6a   : > { %s4948_s11 = scalar_lea.hbm %s5677_s3, %s3819_s17 }
  0x6c   : > { %s4505_s18 = scalar_lea.hbm %s5678_s0, 256 }
  0x6d   : > { %p4506_p10 = scmp.ne.s32.totalorder %s5678_s0, %s4505_s18  ;;  %p4512_p0 = scmp.lt.u32.totalorder %s4505_s18, %s5678_s0 }
  0x6f   : > { %p4508_p1 = pnand %p4507_p13, %p4506_p10 }
  0x71   : > { %p4509_p2 = pneg %p4508_p1 }
  0x73   : > { %p4514_p4 = pnand %p4512_p0, %p4509_p2 }
  0x75   : > { %4517 = shalt.err (!%p4514_p4)
}
  0x76   : > { %s4518_s7 = scalar_lea.vmem %s4933_s13, 256  ;;  %p4526_p7 = scmp.lt.s32.totalorder %s4933_s13, %s4933_s13 }
  0x77   : > { %p4519_p5 = scmp.ne.s32.totalorder %s4933_s13, %s4518_s7  ;;  %p4527_p9 = scmp.lt.s32.totalorder %s4518_s7, %s4518_s7 }
  0x79   : > { %p4521_p11 = pnand %p4519_p5, %p4507_p13  ;;  %p4528_p6 = por %p4527_p9, %p4526_p7 }
  0x7b   : > { %p4522_p3 = pneg %p4521_p11 }
  0x7d   : > { %p4529_p8 = pnand %p4528_p6, %p4522_p3 }
  0x7f   : > { %4532 = shalt.err (!%p4529_p8)
}
  0x80   : > { %s4690_s2 = smov 64   ;;  %s4691_s8 = smov 4  }
  0x81   : > { %4198 = dma.hbm_to_vmem [thread:$0]  (!%p4941_p12), %s5678_s0, 256, %s4933_s13, [#allocation5], %s4690_s2, %s4690_s2, %s4691_s8  }
  0x82   : > { %s4533_s17 = scalar_lea.hbm %s4948_s11, 1024  ;;  %p5679_p8 = scmp.ne.s32.totalorder %s5670_s19, 0 }
  0x83   : > { %p4534_p6 = scmp.ne.s32.totalorder %s4948_s11, %s4533_s17  ;;  %s4538_s15 = scalar_lea.hbm %s5677_s3, 2048 }
  0x84   : > { %p4539_p9 = scmp.lt.u32.totalorder %s4948_s11, %s5677_s3  ;;  %p4540_p10 = scmp.lt.u32.totalorder %s4538_s15, %s4533_s17 }
  0x85   : > { %p4536_p3 = pnand %p4534_p6, %p5679_p8  ;;  %p4542_p1 = scmp.lt.u32.totalorder %s4533_s17, %s4948_s11 }
  0x86   : > { %p4541_p13 = por %p4540_p10, %p4539_p9 }
  0x87   : > { %p4537_p7 = pneg %p4536_p3 }
  0x88   : > { %p4543_p2 = por %p4542_p1, %p4541_p13 }
  0x8a   : > { %p4544_p0 = pnand %p4543_p2, %p4537_p7 }
  0x8c   : > { %4547 = shalt.err (!%p4544_p0)
}
  0x8d   : > { %s4548_s13 = scalar_lea.vmem %s4950_s30, 1024  ;;  %s4692_s21 = smov [#allocation9]  }
  0x8e   : > { %p4549_p12 = scmp.ne.s32.totalorder %s4950_s30, %s4548_s13  ;;  %s4553_s29 = sshll.u32 %s4692_s21, 4  ;;  %s4554_s29 = int_to_ptr.vmem [resolvable:$false] %s4553_s29 }
  0x8f   : > { %s4555_s25 = scalar_lea.vmem %s4554_s29, 2048  ;;  %p4556_p11 = scmp.lt.s32.totalorder %s4950_s30, %s4554_s29 }
  0x90   : > { %p4551_p4 = pnand %p4549_p12, %p5679_p8  ;;  %p4557_p6 = scmp.lt.s32.totalorder %s4555_s25, %s4548_s13 }
  0x92   : > { %p4552_p5 = pneg %p4551_p4  ;;  %p4558_p3 = por %p4557_p6, %p4556_p11 }
  0x94   : > { %p4559_p9 = pnand %p4558_p3, %p4552_p5 }
  0x96   : > { %4562 = shalt.err (!%p4559_p9)
}
  0x97   : > { %p5680_p7 = scmp.ne.s32.totalorder %s5668_s14, 0  ;;  %s4563_s17 = scalar_lea.hbm %s4909_s1, 2048 }
  0x98   : > { %p4564_p10 = scmp.ne.s32.totalorder %s4909_s1, %s4563_s17  ;;  %s4568_s15 = scalar_lea.hbm %s5673_s9, 4096 }
  0x99   : > { %4205 = dma.hbm_to_vmem [thread:$0]  (!%p5680_p7), %s4948_s11, 1024, %s4950_s30, %s4835_s20, %s4690_s2, %s4690_s2, %s4691_s8  }
  0x9a   : > { %p4566_p13 = pnand %p4564_p10, %p5679_p8  ;;  %p4569_p2 = scmp.lt.u32.totalorder %s4909_s1, %s5673_s9 }
  0x9b   : > { %p4570_p0 = scmp.lt.u32.totalorder %s4568_s15, %s4563_s17  ;;  %p4572_p4 = scmp.lt.u32.totalorder %s4563_s17, %s4909_s1 }
  0x9c   : > { %p4567_p1 = pneg %p4566_p13 }
  0x9d   : > { %p4571_p12 = por %p4570_p0, %p4569_p2 }
  0x9f   : > { %p4573_p5 = por %p4572_p4, %p4571_p12 }
  0xa1   : > { %p4574_p11 = pnand %p4573_p5, %p4567_p1 }
  0xa3   : > { %4577 = shalt.err (!%p4574_p11)
}
  0xa4   : > { %s4578_s30 = scalar_lea.vmem %s4913_s24, 2048  ;;  %s4693_s20 = smov [#allocation12]  }
  0xa5   : > { %p4579_p6 = scmp.ne.s32.totalorder %s4913_s24, %s4578_s30  ;;  %s4583_s11 = sshll.u32 %s4693_s20, 4  ;;  %s4584_s11 = int_to_ptr.vmem [resolvable:$false] %s4583_s11 }
  0xa6   : > { %s4585_s13 = scalar_lea.vmem %s4584_s11, 4096  ;;  %p4586_p10 = scmp.lt.s32.totalorder %s4913_s24, %s4584_s11 }
  0xa7   : > { %p4581_p3 = pnand %p4579_p6, %p5679_p8  ;;  %p4587_p13 = scmp.lt.s32.totalorder %s4585_s13, %s4578_s30 }
  0xa9   : > { %p4582_p9 = pneg %p4581_p3  ;;  %p4588_p2 = por %p4587_p13, %p4586_p10 }
  0xab   : > { %p4589_p0 = pnand %p4588_p2, %p4582_p9 }
  0xad   : > { %4592 = shalt.err (!%p4589_p0)
}
  0xae   : > { %4211 = dma.hbm_to_vmem [thread:$0]  (!%p5680_p7), %s4909_s1, 2048, %s4913_s24, %s4880_s10, %s4690_s2, %s4690_s2, %s4691_s8  }
  0xaf   : > { %p5681_p8 = scmp.ne.s32.totalorder %s5675_s22, 0 }
  0xb0   : > { %p5682_p1 = scmp.eq.s32.totalorder (!%p5681_p8), %s4916_s27, 0 }
  0xb1   : > { %577 = sbr.rel (%p5681_p8) target bundleno = 4496 (0x1190), region = 72 }
  0xb8   : > { %4644 = dma.done.wait (%p5682_p1), [#allocation5], 256   ;;  %p5683_p12 = pmov %p5682_p1 }
  0xb9   : > { %s583_s14 = sand.u32 1, %s4916_s27   ;;  %s585_s19 = sand.u32 1, %s4665_s26  }
  0xba   : > { %4646 = vsyncadd (%p5683_p12), [#allocation5], 4294967040  ;;  %s4177_s21 = smul.u32 192, %s585_s19  ;;  %s584_s29 = scalar_lea.sflag [#allocation8], %s583_s14 }
  0xbb   : > { %p5684_p4 = scmp.ne.s32.totalorder %s5674_s12, 0 }
  0xbc   : > { %s5034_s25 = scalar_lea.vmem [#allocation7], %s4177_s21 }
  0xbd   : > { %4648 = dma.done.wait (%p5684_p4), %s584_s29, 4096  }
  0xbe   : > { %4650 = vsyncadd (%p5684_p4), %s584_s29, 4294963200  ;;  %s3707_s10 = sshll.u32 %s585_s19, 6  ;;  %s3708_s1 = sshll.u32 %s585_s19, 7 }
  0xbf   : > { %s5040_s24 = scalar_lea.vmem [#allocation9], %s3707_s10  ;;  %s602_s22 = scalar_lea.sflag [#allocation11], %s583_s14 }
  0xc0   : > { %s5042_s2 = scalar_lea.vmem [#allocation10], %s3708_s1 }
  0xc1   : > { %4652 = dma.done.wait (%p5684_p4), %s602_s22, 4096  }
  0xc2   : > { %4654 = vsyncadd (%p5684_p4), %s602_s22, 4294963200  ;;  %p694_p7 = scmp.lt.s32.totalorder %s4673_s28, 1  ;;  %s5685_s19 = sld [smem:[#allocation26_spill]] }
  0xc3   : > { %s5686_s0 = sld [smem:[#allocation29_spill]]  ;;  %s5687_s15 = sld [smem:[#allocation31_spill]] }
  0xc4   : > { %s5050_s8 = scalar_select %p694_p7, %s4673_s28, 1 }
  0xc5   : > { %s5688_s9 = sld [smem:[#allocation32_spill]]  ;;  %s5689_s26 = sld [smem:[#allocation33_spill]] }
  0xc6   : > { %s4178_s17 = smul.u32 3, %s5050_s8  ;;  %s3710_s29 = sshll.u32 %s5050_s8, 1 }
  0xc7   : > { %p3711_p5 = scmp.ne.s32.totalorder %s4673_s28, 0 }
  0xc8   : > { %s5068_s21 = scalar_lea.vmem %s5685_s19, %s4178_s17  ;;  %s5088_s17 = scalar_lea.vmem [#allocation12], %s3708_s1  ;;  %v3823_v0 = vld [vmem:[#allocation4] sm:$0xff] (!%p3711_p5)   ;;  %v3830_v1 = vld [vmem:[#allocation4 + $0x8] sm:$0xff] (!%p3711_p5)  }
  0xc9   : > { %s5074_s3 = scalar_lea.vmem %s5686_s0, %s3710_s29  ;;  %s713_s12 = scalar_lea.vmem %s5687_s15, %s5050_s8  ;;  %v3824_v2 = vunpack.c.l.bf16 (!%p3711_p5), %v3823_v0  ;;  %v3825_v3 = vunpack.c.h.bf16 (!%p3711_p5), %v3823_v0  ;;  %v3828_v4 = vunpack.c.l.bf16 (!%p3711_p5), %v3830_v1  ;;  %v3829_v5 = vunpack.c.h.bf16 (!%p3711_p5), %v3830_v1 }
  0xca   : > { %725 = sbr.rel (%p3711_p5) target bundleno = 209 (0xd1), region = 96 }
  0xcb   : > { %s716_s30 = scalar_lea.vmem %s5688_s9, %s5050_s8  ;;  %s719_s13 = scalar_lea.vmem %s5689_s26, %s5050_s8  ;;  %734 = vst [vmem:[#allocation2] sm:$0xff] (!%p3711_p5), %v3824_v2  ;;  %735 = vst [vmem:[#allocation2 + $0x8] sm:$0xff] (!%p3711_p5), %v3825_v3 }
  0xcc   : > { %736 = vst [vmem:[#allocation2 + $0x10] sm:$0xff] (!%p3711_p5), %v3828_v4  ;;  %737 = vst [vmem:[#allocation2 + $0x18] sm:$0xff] (!%p3711_p5), %v3829_v5 }
  0xd1 PF: > { %v4281_v6 = vld [vmem:[%s5034_s25 + $0x4] ss:$12 sps:$4 sm:$0xff]   ;;  %v4283_v7 = vld [vmem:[%s5034_s25] ss:$12 sps:$4 sm:$0xff]   ;;  %v4694_v8 = vmov 0   ;;  %v4695_v37 = vmov 0.0   ;;  %v778_v38 = vlaneseq  ;;  %s5691_s7 = scalar_lea.vmem %s5628_s5, %s5050_s8  ;;  %s5692_s19 = scalar_lea.vmem %s5629_s6, %s5050_s8 }
  0xd2   : > { %953 = vmatprep.mubr.bf16.mxu0 %v4694_v8  ;;  %921 = vmatprep.subr.bf16.mxu0 %v4281_v6  ;;  %v4284_v9 = vld [vmem:[%s5034_s25 + $0x1c] ss:$12 sps:$4 sm:$0xff]   ;;  %v4286_v10 = vld [vmem:[%s5034_s25 + $0x18] ss:$12 sps:$4 sm:$0xff]   ;;  %v4287_v11 = vld [vmem:[%s5034_s25 + $0x34] ss:$12 sps:$4 sm:$0xff]  }
  0xd3   : > { %922 = vmatpush1.bf16.msra.mxu0 %v4283_v7  ;;  %v4289_v12 = vld [vmem:[%s5034_s25 + $0x30] ss:$12 sps:$4 sm:$0xff]   ;;  %v4290_v13 = vld [vmem:[%s5034_s25 + $0x4c] ss:$12 sps:$4 sm:$0xff]   ;;  %v738_v14 = vld [vmem:[#allocation2] sm:$0xff]  ;;  %vm4696_vm0 = vmmov 0  }
  0xd4   : > { %923 = vmatprep.subr.bf16.mxu0 %v4284_v9  ;;  %v4292_v15 = vld [vmem:[%s5034_s25 + $0x48] ss:$12 sps:$4 sm:$0xff]   ;;  %v4293_v16 = vld [vmem:[%s5034_s25 + $0x64] ss:$12 sps:$4 sm:$0xff]   ;;  %v4306_v20 = vld [vmem:[%s5034_s25 + $0x20] ss:$12 sps:$4 sm:$0xff]  }
  0xd5   : > { %v739_v17 = vld [vmem:[#allocation2 + $0x8] sm:$0xff]  ;;  %v4307_v23 = vld [vmem:[%s5034_s25 + $0x38] ss:$12 sps:$4 sm:$0xff]   ;;  %v4299_v25 = vld [vmem:[%s5034_s25 + $0x94] ss:$12 sps:$4 sm:$0xff]   ;;  %v5123_v39 = vshrl.u32 %v778_v38, 7 }
  0xd6   : > { %v742_v18 = vpack.c.bf16 %v739_v17, %v738_v14  ;;  %v4305_v19 = vld [vmem:[%s5034_s25 + $0x8] ss:$12 sps:$4 sm:$0xff]   ;;  %v4295_v21 = vld [vmem:[%s5034_s25 + $0x60] ss:$12 sps:$4 sm:$0xff]   ;;  %v4298_v24 = vld [vmem:[%s5034_s25 + $0x78] ss:$12 sps:$4 sm:$0xff]  }
  0xd7   : > { %924 = vmatpush1.bf16.msra.mxu0 %v4286_v10  ;;  %3943 = vmatprep.subr.bf16.mxu1 %v4305_v19  ;;  %v4296_v22 = vld [vmem:[%s5034_s25 + $0x7c] ss:$12 sps:$4 sm:$0xff]   ;;  %v4302_v28 = vld [vmem:[%s5034_s25 + $0xac] ss:$12 sps:$4 sm:$0xff]   ;;  %v740_v32 = vld [vmem:[#allocation2 + $0x10] sm:$0xff]  ;;  %v784_v40 = vsub.s32 1, %v5123_v39 }
  0xd8   : > { %925 = vmatprep.subr.bf16.mxu0 %v4287_v11  ;;  %3959 = vmatprep.mubr.bf16.mxu1 %v742_v18  ;;  %v4308_v26 = vld [vmem:[%s5034_s25 + $0x50] ss:$12 sps:$4 sm:$0xff]   ;;  %v4309_v29 = vld [vmem:[%s5034_s25 + $0x68] ss:$12 sps:$4 sm:$0xff]   ;;  %v4310_v31 = vld [vmem:[%s5034_s25 + $0x80] ss:$12 sps:$4 sm:$0xff]  }
  0xd9   : > { %3944 = vmatpush3.bf16.msra.mxu1 %v4305_v19  ;;  %v4301_v27 = vld [vmem:[%s5034_s25 + $0x90] ss:$12 sps:$4 sm:$0xff]   ;;  %v4304_v30 = vld [vmem:[%s5034_s25 + $0xa8] ss:$12 sps:$4 sm:$0xff]   ;;  %v4311_v35 = vld [vmem:[%s5034_s25 + $0x98] ss:$12 sps:$4 sm:$0xff]  }
  0xda   : > { %3945 = vmatprep.subr.bf16.mxu1 %v4306_v20  ;;  %v741_v33 = vld [vmem:[#allocation2 + $0x18] sm:$0xff]  ;;  %v776_v41 = vld [vmem:[%s5068_s21] sm:$0x7]  ;;  %v780_v43 = vsub.s32 0, %v5123_v39  ;;  %vm1035_vm1 = vcmask 261120   ;;  %v788_v10 = vsub.s32 2, %v5123_v39 }
  0xdb   : > { %926 = vmatpush1.bf16.msra.mxu0 %v4289_v12  ;;  %v743_v34 = vpack.c.bf16 %v741_v33, %v740_v32  ;;  %v4312_v36 = vld [vmem:[%s5034_s25 + $0xb0] ss:$12 sps:$4 sm:$0xff]   ;;  %v785_v42 = vrot.slane %v776_v41, %v784_v40  ;;  %vm1272_vm2 = vcmask 1043456   ;;  %vm1220_vm3 = vcmask 64512   ;;  %s4697_s0 = smov 96   ;;  %s4698_s9 = smov 64  }
  0xdc   : > { %927 = vmatprep.subr.bf16.mxu0 %v4290_v13  ;;  %v781_v49 = vrot.slane %v776_v41, %v780_v43  ;;  %v789_v13 = vrot.slane %v776_v41, %v788_v10  ;;  %s4699_s26 = smov 32   ;;  %vm1920_vm4 = vcmask 523520   ;;  %vm2373_vm5 = vcmask 785920   ;;  %p3814_p11 = scmp.ne.s32.totalorder %s4673_s28, 1 }
  0xdd   : > { %3946 = vmatpush3.bf16.msra.mxu1 %v4306_v20  ;;  %vm2826_vm6 = vcmask 1048320  }
  0xde   : > { %3947 = vmatprep.subr.bf16.mxu1 %v4307_v23 }
  0xdf   : > { %928 = vmatpush1.bf16.msra.mxu0 %v4292_v15 }
  0xe0   : > { %929 = vmatprep.subr.bf16.mxu0 %v4293_v16 }
  0xe1   : > { %3948 = vmatpush3.bf16.msra.mxu1 %v4307_v23 }
  0xe2   : > { %3949 = vmatprep.subr.bf16.mxu1 %v4308_v26 }
  0xe3   : > { %930 = vmatpush1.bf16.msra.mxu0 %v4295_v21 }
  0xe4   : > { %931 = vmatprep.subr.bf16.mxu0 %v4296_v22 }
  0xe5   : > { %3950 = vmatpush3.bf16.msra.mxu1 %v4308_v26 }
  0xe6   : > { %3951 = vmatprep.subr.bf16.mxu1 %v4309_v29 }
  0xe7   : > { %932 = vmatpush1.bf16.msra.mxu0 %v4298_v24 }
  0xe8   : > { %933 = vmatprep.subr.bf16.mxu0 %v4299_v25 }
  0xe9   : > { %3952 = vmatpush3.bf16.msra.mxu1 %v4309_v29 }
  0xea   : > { %3953 = vmatprep.subr.bf16.mxu1 %v4310_v31 }
  0xeb   : > { %934 = vmatpush1.bf16.msra.mxu0 %v4301_v27 }
  0xec   : > { %935 = vmatprep.subr.bf16.mxu0 %v4302_v28 }
  0xed   : > { %3954 = vmatpush3.bf16.msra.mxu1 %v4310_v31 }
  0xee   : > { %3955 = vmatprep.subr.bf16.mxu1 %v4311_v35 }
  0xef   : > { %936 = vmatpush1.bf16.msra.mxu0 %v4304_v30 }
  0xf0   : > { %3963 = vmatprep.subr.bf16.mxu0 %v4695_v37 }
  0xf1   : > { %3956 = vmatpush3.bf16.msra.mxu1 %v4311_v35 }
  0xf2   : > { %954 = vmatmul.mubr.bf16.vlgmr.msra.gmra.mrb[0].mxu0 %v742_v18  ;;  %3957 = vmatprep.subr.bf16.mxu1 %v4312_v36 }
  0xf3   : > { %963 = vmatprep.mubr.bf16.mxu0 %v4694_v8 }
  0xf5   : > { %3958 = vmatpush3.bf16.msra.mxu1 %v4312_v36 }
  0xf6   : > { %3975 = vmatprep.subr.bf16.mxu1 %v4695_v37 }
  0xf8   : > { %3960 = vmatmul.mubr.bf16.vlgmr.msra.gmra.mrb[0].mxu1 %v743_v34 }
  0xf9   : > { %3977 = vmatprep.mubr.msk.bf16.mxu1 %vm4696_vm0, %v4695_v37 }
  0xfa   : > { %964 = vmatmul.mubr.bf16.gmra.mrb[4].mxu0 %v743_v34 }
  0xfb   : > { %3965 = vmatprep.mubr.msk.bf16.mxu0 %vm4696_vm0, %v4695_v37 }
 0x1c5   : > { %v955_v44 = vpop.f32.mrb[0].mxu0 }
 0x1c6   : > { %v957_v45 = vpop.f32.mrb[1].mxu0  ;;  %v956_v53 = vadd.f32 %v955_v44, %v781_v49 }
 0x1c7   : > { %v958_v46 = vadd.f32 %v957_v45, %v785_v42  ;;  %v959_v47 = vpop.f32.mrb[2].mxu0 }
 0x1c8   : > { %v961_v48 = vpop.f32.mrb[3].mxu0  ;;  %v5139_v60 = vpack.c.bf16 %v956_v53, %v956_v53  ;;  %v960_v2 = vadd.f32 %v959_v47, %v781_v49 }
 0x1c9   : > { %v5132_v50 = vpack.c.bf16 %v958_v46, %v958_v46  ;;  %v962_v51 = vadd.f32 %v961_v48, %v785_v42 }
 0x1ca   : > { %v5157_v5 = vpack.c.bf16 %v960_v2, %v960_v2 }
 0x1cb   : > { %v1040_v52 = vsel %vm1035_vm1, %v5132_v50, 0  ;;  %v5137_v56 = vpack.c.bf16 %v962_v51, %v962_v51  ;;  %v3961_v11 = vpop.f32.mrb[0].mxu1 }
 0x1cc   : > { %3964 = vmatpush3.bf16.xpose.msra.mxu0 %v1040_v52  ;;  %v1008_v12 = vpop.f32.mrb[1].mxu1  ;;  %v5177_v16 = vadd.f32 %v3961_v11, %v789_v13 }
 0x1cd   : > { %v965_v54 = vpop.f32.mrb[4].mxu0  ;;  %3969 = vmatprep.subr.bf16.mxu0 %v4695_v37  ;;  %v1086_v0 = vsel %vm1035_vm1, %v5137_v56, 0  ;;  %v3962_v14 = vpop.f32.mrb[2].mxu1  ;;  %v1009_v18 = vadd.f32 %v1008_v12, %v789_v13 }
 0x1ce   : > { %v967_v55 = vpop.f32.mrb[5].mxu0  ;;  %v966_v63 = vadd.f32 %v965_v54, %v781_v49  ;;  %v1011_v15 = vpop.f32.mrb[3].mxu1  ;;  %v5179_v17 = vadd.f32 %v3962_v14, %v789_v13 }
 0x1cf   : > { %v968_v57 = vadd.f32 %v967_v55, %v785_v42  ;;  %v969_v58 = vpop.f32.mrb[6].mxu0  ;;  %v1012_v19 = vadd.f32 %v1011_v15, %v789_v13  ;;  %v5181_v20 = vpack.c.bf16 %v1009_v18, %v1009_v18 }
 0x1d0   : > { %v971_v59 = vpop.f32.mrb[7].mxu0  ;;  %v5155_v4 = vpack.c.bf16 %v966_v63, %v966_v63  ;;  %v970_v7 = vadd.f32 %v969_v58, %v781_v49 }
 0x1d1   : > { %v5141_v61 = vpack.c.bf16 %v968_v57, %v968_v57  ;;  %v972_v62 = vadd.f32 %v971_v59, %v785_v42  ;;  %v5183_v21 = vpack.c.bf16 %v1012_v19, %v1012_v19  ;;  %v1274_v22 = vsel %vm1272_vm2, %v5181_v20, 0 }
 0x1d2   : > { %v5170_v9 = vpack.c.bf16 %v970_v7, %v970_v7  ;;  %v5217_v19 = vpack.c.bf16 %v5177_v16, %v5177_v16  ;;  %v5227_v16 = vpack.c.bf16 %v5179_v17, %v5179_v17 }
 0x1d3   : > { %3966 = vmatmul.mubr.msk.bf16.vlgmr.msra.gmra.mrb[8].mxu0 %vm1035_vm1, %v5139_v60  ;;  %v1132_v1 = vsel %vm1035_vm1, %v5141_v61, 0  ;;  %v5149_v3 = vpack.c.bf16 %v972_v62, %v972_v62  ;;  %v1320_v23 = vsel %vm1272_vm2, %v5183_v21, 0 }
 0x1d4   : > { %3970 = vmatpush3.bf16.xpose.msra.mxu0 %v1086_v0  ;;  %3976 = vmatpush3.bf16.xpose.msra.mxu1 %v1132_v1 }
 0x1d5   : > { %3971 = vmatprep.mubr.msk.bf16.mxu0 %vm4696_vm0, %v4695_v37  ;;  %3981 = vmatprep.subr.bf16.mxu0 %v4695_v37  ;;  %v1178_v6 = vsel %vm1035_vm1, %v5149_v3, 0 }
 0x1d6   : > { %3987 = vmatprep.subr.bf16.mxu1 %v4695_v37 }
 0x1db   : > { %3972 = vmatmul.mubr.msk.bf16.vlgmr.msra.gmra.mrb[12].mxu0 %vm1035_vm1, %v5157_v5  ;;  %3978 = vmatmul.mubr.msk.bf16.vlgmr.msra.gmra.mrb[4].mxu1 %vm1035_vm1, %v5155_v4 }
 0x1dc   : > { %3982 = vmatpush3.bf16.xpose.msra.mxu0 %v1178_v6  ;;  %3983 = vmatprep.mubr.msk.bf16.mxu0 %vm4696_vm0, %v4695_v37 }
 0x1dd   : > { %3993 = vmatprep.subr.bf16.mxu0 %v4695_v37  ;;  %3989 = vmatprep.mubr.msk.bf16.mxu1 %vm4696_vm0, %v4695_v37 }
 0x1de   : > { %3988 = vmatpush3.bf16.msra.mxu1 %v1274_v22 }
 0x1df   : > { %3999 = vmatprep.subr.bf16.mxu1 %v4695_v37 }
 0x1e3   : > { %3984 = vmatmul.mubr.msk.bf16.vlgmr.msra.gmra.mrb[16].mxu0 %vm1035_vm1, %v5170_v9 }
 0x1e4   : > { %3995 = vmatprep.mubr.msk.bf16.mxu0 %vm4696_vm0, %v4695_v37  ;;  %3994 = vmatpush3.bf16.msra.mxu0 %v1320_v23 }
 0x1e5   : > { %4005 = vmatprep.subr.bf16.mxu0 %v4695_v37 }
 0x2a6   : > { %v1076_v24 = vpop.f32.mrb[8].mxu0 }
 0x2a7   : > { %v3967_v25 = vpop.f32.mrb[9].mxu0  ;;  %v1221_v26 = vsel %vm1220_vm3, %v1076_v24, -inf }
 0x2a8   : > { %1222 = vmax.xlane.f32.xlu0 %v1221_v26  ;;  %v1079_v27 = vpop.f32.mrb[10].mxu0 }
 0x2a9   : > { %v3968_v28 = vpop.f32.mrb[11].mxu0 }
 0x2ae   : > { %v1122_v29 = vpop.f32.mrb[12].mxu0  ;;  %v1168_v30 = vpop.f32.mrb[4].mxu1 }
 0x2af   : > { %v3973_v31 = vpop.f32.mrb[13].mxu0  ;;  %v1227_v32 = vsel %vm1220_vm3, %v1168_v30, -inf  ;;  %v1224_v33 = vsel %vm1220_vm3, %v1122_v29, -inf  ;;  %v3979_v34 = vpop.f32.mrb[5].mxu1 }
 0x2b0   : > { %1228 = vmax.xlane.f32.xlu1 %v1227_v32  ;;  %1225 = vmax.xlane.f32.xlu0 %v1224_v33  ;;  %v1125_v35 = vpop.f32.mrb[14].mxu0  ;;  %v1171_v36 = vpop.f32.mrb[6].mxu1  ;;  %v1412_v33 = vsel %vm1272_vm2, %v5227_v16, 0 }
 0x2b1   : > { %v3974_v38 = vpop.f32.mrb[15].mxu0  ;;  %v3980_v41 = vpop.f32.mrb[7].mxu1 }
 0x2b6   : > { %v1214_v42 = vpop.f32.mrb[16].mxu0 }
 0x2b7   : > { %v1230_v44 = vsel %vm1220_vm3, %v1214_v42, -inf  ;;  %v3985_v45 = vpop.f32.mrb[17].mxu0 }
 0x2b8   : > { %1231 = vmax.xlane.f32.xlu1 %v1230_v44  ;;  %v1217_v46 = vpop.f32.mrb[18].mxu0 }
 0x2b9   : > { %v3986_v47 = vpop.f32.mrb[19].mxu0 }
 0x335   : > { %v1223_v48 = vpop.xlane.xlu0 %1222 }
 0x336   : > { %v1233_v49 = vsub.f32 %v1076_v24, %v1223_v48  ;;  %v1366_v24 = vsel %vm1272_vm2, %v5217_v19, 0 }
 0x338   : > { %v1237_v51 = vmul.f32 1.442695, %v1233_v49 }
 0x33a   : > { %4361 = vpow2.f32 %v1237_v51 }
 0x33d   : > { %v1229_v52 = vpop.xlane.xlu1 %1228  ;;  %v1226_v53 = vpop.xlane.xlu0 %1225 }
 0x33e   : > { %v1235_v54 = vsub.f32 %v1168_v30, %v1229_v52  ;;  %v1234_v55 = vsub.f32 %v1122_v29, %v1226_v53 }
 0x340   : > { %v1241_v57 = vmul.f32 1.442695, %v1235_v54  ;;  %v1239_v58 = vmul.f32 1.442695, %v1234_v55 }
 0x342   : > { %4363 = vpow2.f32 %v1241_v57 }
 0x343   : > { %4365 = vpow2.f32 %v1239_v58 }
 0x344   : > { %v4362_v59 = vpop.eup %4361 }
 0x345   : > { %v1245_v62 = vsel %vm1220_vm3, %v4362_v59, 0.0  ;;  %v1232_v6 = vpop.xlane.xlu1 %1231 }
 0x346   : > { %1246 = vadd.xlane.f32.xlu0 %v1245_v62  ;;  %v1236_v7 = vsub.f32 %v1214_v42, %v1232_v6 }
 0x348   : > { %v1243_v10 = vmul.f32 1.442695, %v1236_v7 }
 0x34a   : > { %4367 = vpow2.f32 %v1243_v10 }
 0x34c   : > { %v4364_v63 = vpop.eup %4363 }
 0x34d   : > { %v4366_v0 = vpop.eup %4365  ;;  %v1251_v1 = vsel %vm1220_vm3, %v4364_v63, 0.0 }
 0x34e   : > { %1252 = vadd.xlane.f32.xlu0 %v1251_v1  ;;  %v1248_v2 = vsel %vm1220_vm3, %v4366_v0, 0.0 }
 0x34f   : > { %1249 = vadd.xlane.f32.xlu1 %v1248_v2 }
 0x354   : > { %v4368_v11 = vpop.eup %4367 }
 0x355   : > { %v1254_v12 = vsel %vm1220_vm3, %v4368_v11, 0.0 }
 0x360   : > { %1514 = vrot.lane.b32.xlu1 %v5137_v56, %s4697_s0 }
 0x364   : > { %1459 = vrot.lane.b32.xlu1 %v5139_v60, %s4697_s0  ;;  %1462 = vrot.lane.b32.xlu0 %v5132_v50, %s4697_s0 }
 0x368   : > { %1566 = vrot.lane.b32.xlu0 %v5141_v61, %s4697_s0 }
 0x36c   : > { %1563 = vrot.lane.b32.xlu0 %v5155_v4, %s4697_s0 }
 0x388   : > { %1255 = vadd.xlane.f32.xlu1 %v1254_v12 }
 0x399   : > { %1511 = vrot.lane.b32.xlu1 %v5157_v5, %s4697_s0 }
 0x39d   : > { %1618 = vrot.lane.b32.xlu1 %v5149_v3, %s4697_s0 }
 0x3a1   : > { %1615 = vrot.lane.b32.xlu1 %v5170_v9, %s4697_s0 }
 0x3d3   : > { %v1247_v13 = vpop.xlane.xlu0 %1246 }
 0x3d4   : > { %4369 = vrcp.f32 %v1247_v13 }
 0x3db   : > { %v1253_v14 = vpop.xlane.xlu0 %1252 }
 0x3dc   : > { %4371 = vrcp.f32 %v1253_v14  ;;  %v1250_v15 = vpop.xlane.xlu1 %1249 }
 0x3dd   : > { %4373 = vrcp.f32 %v1250_v15 }
 0x3de   : > { %v4370_v18 = vpop.eup %4369 }
 0x3df   : > { %v1261_v22 = vmul.f32 %v4370_v18, %v4362_v59  ;;  %v1463_v29 = vpop.permute.xlu0 %1462 }
 0x3e0   : > { %v1468_v32 = vsel %vm1035_vm1, %v1463_v29, 0  ;;  %v1515_v34 = vpop.permute.xlu1 %1514 }
 0x3e1   : > { %v1265_v23 = vpack.c.bf16 %v1261_v22, %v1261_v22  ;;  %v1520_v47 = vsel %vm1035_vm1, %v1515_v34, 0 }
 0x3e3   : > { %3990 = vmatmul.mubr.msk.bf16.vlgmr.msra.gmra.mrb[8].mxu1 %vm1220_vm3, %v1265_v23  ;;  %v1567_v17 = vpop.permute.xlu0 %1566 }
 0x3e4   : > { %4000 = vmatpush3.bf16.msra.mxu1 %v1366_v24  ;;  %4001 = vmatprep.mubr.msk.bf16.mxu1 %vm4696_vm0, %v4695_v37  ;;  %v1460_v35 = vpop.permute.xlu1 %1459  ;;  %v1572_v36 = vsel %vm1035_vm1, %v1567_v17, 0 }
 0x3e5   : > { %4011 = vmatprep.subr.bf16.mxu1 %v4695_v37 }
 0x3e6   : > { %v4372_v25 = vpop.eup %4371 }
 0x3e7   : > { %v4374_v26 = vpop.eup %4373  ;;  %v1263_v27 = vmul.f32 %v4372_v25, %v4364_v63  ;;  %v1564_v38 = vpop.permute.xlu0 %1563 }
 0x3e8   : > { %v1262_v28 = vmul.f32 %v4374_v26, %v4366_v0 }
 0x3e9   : > { %v1267_v30 = vpack.c.bf16 %v1263_v27, %v1263_v27 }
 0x3ea   : > { %v1266_v31 = vpack.c.bf16 %v1262_v28, %v1262_v28 }
 0x3eb   : > { %4002 = vmatmul.mubr.msk.bf16.vlgmr.msra.gmra.mrb[12].mxu1 %vm1220_vm3, %v1267_v30 }
 0x3ec   : > { %3996 = vmatmul.mubr.msk.bf16.vlgmr.msra.gmra.mrb[20].mxu0 %vm1220_vm3, %v1266_v31  ;;  %4013 = vmatprep.mubr.msk.bf16.mxu1 %vm4696_vm0, %v4695_v37 }
 0x3ed   : > { %4006 = vmatpush3.bf16.msra.mxu0 %v1412_v33  ;;  %4012 = vmatpush3.bf16.xpose.msra.mxu1 %v1468_v32 }
 0x3ee   : > { %4023 = vmatprep.subr.bf16.mxu1 %v4695_v37  ;;  %4007 = vmatprep.mubr.msk.bf16.mxu0 %vm4696_vm0, %v4695_v37 }
 0x3ef   : > { %4017 = vmatprep.subr.bf16.mxu0 %v4695_v37 }
 0x3f4   : > { %4014 = vmatmul.mubr.msk.bf16.vlgmr.msra.gmra.mrb[16].mxu1 %vm1035_vm1, %v1460_v35 }
 0x3f5   : > { %4024 = vmatpush3.bf16.xpose.msra.mxu1 %v1572_v36  ;;  %4025 = vmatprep.mubr.msk.bf16.mxu1 %vm4696_vm0, %v4695_v37 }
 0x3f6   : > { %4035 = vmatprep.subr.bf16.mxu1 %v4695_v37 }
 0x3fc   : > { %4026 = vmatmul.mubr.msk.bf16.vlgmr.msra.gmra.mrb[20].mxu1 %vm1035_vm1, %v1564_v38 }
 0x3fd   : > { %4037 = vmatprep.mubr.msk.bf16.mxu1 %vm4696_vm0, %v4695_v37 }
 0x415   : > { %v1256_v41 = vpop.xlane.xlu1 %1255 }
 0x416   : > { %4375 = vrcp.f32 %v1256_v41 }
 0x419   : > { %v1512_v46 = vpop.permute.xlu1 %1511 }
 0x41d   : > { %v1619_v48 = vpop.permute.xlu1 %1618 }
 0x41e   : > { %v1624_v49 = vsel %vm1035_vm1, %v1619_v48, 0 }
 0x420   : > { %v4376_v42 = vpop.eup %4375 }
 0x421   : > { %v1264_v44 = vmul.f32 %v4376_v42, %v4368_v11  ;;  %v1616_v51 = vpop.permute.xlu1 %1615 }
 0x423   : > { %v1268_v45 = vpack.c.bf16 %v1264_v44, %v1264_v44 }
 0x425   : > { %4008 = vmatmul.mubr.msk.bf16.vlgmr.msra.gmra.mrb[24].mxu0 %vm1220_vm3, %v1268_v45 }
 0x426   : > { %4018 = vmatpush3.bf16.xpose.msra.mxu0 %v1520_v47  ;;  %4019 = vmatprep.mubr.msk.bf16.mxu0 %vm4696_vm0, %v4695_v37 }
 0x427   : > { %4029 = vmatprep.subr.bf16.mxu0 %v4695_v37 }
 0x42d   : > { %4020 = vmatmul.mubr.msk.bf16.vlgmr.msra.gmra.mrb[28].mxu0 %vm1035_vm1, %v1512_v46 }
 0x42e   : > { %4030 = vmatpush3.bf16.xpose.msra.mxu0 %v1624_v49  ;;  %4031 = vmatprep.mubr.msk.bf16.mxu0 %vm4696_vm0, %v4695_v37 }
 0x42f   : > { %4041 = vmatprep.subr.bf16.mxu0 %v4695_v37 }
 0x435   : > { %4032 = vmatmul.mubr.msk.bf16.vlgmr.msra.gmra.mrb[32].mxu0 %vm1035_vm1, %v1616_v51 }
 0x436   : > { %4043 = vmatprep.mubr.msk.bf16.mxu0 %vm4696_vm0, %v4695_v37 }
 0x4b6   : > { %v1310_v52 = vpop.f32.mrb[8].mxu1 }
 0x4b7   : > { %v3991_v53 = vpop.f32.mrb[9].mxu1 }
 0x4b8   : > { %v1313_v54 = vpop.f32.mrb[10].mxu1 }
 0x4b9   : > { %v3992_v55 = vpop.f32.mrb[11].mxu1 }
 0x4be   : > { %v1402_v57 = vpop.f32.mrb[12].mxu1 }
 0x4bf   : > { %v1356_v58 = vpop.f32.mrb[20].mxu0  ;;  %v4003_v59 = vpop.f32.mrb[13].mxu1 }
 0x4c0   : > { %v1454_v62 = vpack.c.bf16 %v1356_v58, %v1310_v52  ;;  %v3997_v63 = vpop.f32.mrb[21].mxu0  ;;  %v1405_v0 = vpop.f32.mrb[14].mxu1 }
 0x4c1   : > { %v1359_v1 = vpop.f32.mrb[22].mxu0  ;;  %v4004_v2 = vpop.f32.mrb[15].mxu1 }
 0x4c2   : > { %1456 = vst.msk [vmem:[#allocation3] sm:$0xff] %vm1035_vm1, %v1454_v62  ;;  %v3998_v6 = vpop.f32.mrb[23].mxu0 }
 0x4c7   : > { %v1504_v7 = vpop.f32.mrb[16].mxu1 }
 0x4c8   : > { %v4015_v10 = vpop.f32.mrb[17].mxu1  ;;  %v1666_v11 = vsel %vm1220_vm3, %v1504_v7, -inf }
 0x4c9   : > { %1667 = vmax.xlane.f32.xlu0 %v1666_v11  ;;  %v1507_v12 = vpop.f32.mrb[18].mxu1 }
 0x4ca   : > { %v4016_v13 = vpop.f32.mrb[19].mxu1 }
 0x4cf   : > { %v1608_v14 = vpop.f32.mrb[20].mxu1 }
 0x4d0   : > { %v4027_v15 = vpop.f32.mrb[21].mxu1  ;;  %v1672_v18 = vsel %vm1220_vm3, %v1608_v14, -inf }
 0x4d1   : > { %1673 = vmax.xlane.f32.xlu0 %v1672_v18  ;;  %v1611_v22 = vpop.f32.mrb[22].mxu1 }
 0x4d2   : > { %v4028_v23 = vpop.f32.mrb[23].mxu1 }
 0x4f8   : > { %v1448_v24 = vpop.f32.mrb[24].mxu0 }
 0x4f9   : > { %v1455_v25 = vpack.c.bf16 %v1448_v24, %v1402_v57  ;;  %v4009_v26 = vpop.f32.mrb[25].mxu0 }
 0x4fa   : > { %v1451_v27 = vpop.f32.mrb[26].mxu0 }
 0x4fb   : > { %1457 = vst.msk [vmem:[#allocation3 + $0x8] sm:$0xff] %vm1035_vm1, %v1455_v25  ;;  %v4010_v28 = vpop.f32.mrb[27].mxu0 }
 0x500   : > { %v1556_v29 = vpop.f32.mrb[28].mxu0 }
 0x501   : > { %v4021_v30 = vpop.f32.mrb[29].mxu0  ;;  %v1669_v31 = vsel %vm1220_vm3, %v1556_v29, -inf }
 0x502   : > { %1670 = vmax.xlane.f32.xlu1 %v1669_v31  ;;  %v1559_v32 = vpop.f32.mrb[30].mxu0 }
 0x503   : > { %v4022_v33 = vpop.f32.mrb[31].mxu0 }
 0x508   : > { %v1660_v34 = vpop.f32.mrb[32].mxu0 }
 0x509   : > { %v4033_v17 = vpop.f32.mrb[33].mxu0  ;;  %v1675_v35 = vsel %vm1220_vm3, %v1660_v34, -inf }
 0x50a   : > { %1676 = vmax.xlane.f32.xlu0 %v1675_v35  ;;  %v1663_v36 = vpop.f32.mrb[34].mxu0 }
 0x50b   : > { %v4034_v38 = vpop.f32.mrb[35].mxu0 }
 0x513   : > { %1764 = vrot.lane.b32.xlu1 %v5183_v21, %s4697_s0 }
 0x517   : > { %1813 = vrot.lane.b32.xlu1 %v5217_v19, %s4697_s0 }
 0x51b   : > { %1862 = vrot.lane.b32.xlu1 %v5227_v16, %s4697_s0 }
 0x556   : > { %v1668_v41 = vpop.xlane.xlu0 %1667 }
 0x557   : > { %v1678_v42 = vsub.f32 %v1504_v7, %v1668_v41 }
 0x559   : > { %v1682_v44 = vmul.f32 1.442695, %v1678_v42 }
 0x55b   : > { %4377 = vpow2.f32 %v1682_v44 }
 0x55e   : > { %v1674_v47 = vpop.xlane.xlu0 %1673 }
 0x55f   : > { %v1680_v48 = vsub.f32 %v1608_v14, %v1674_v47 }
 0x561   : > { %v1686_v49 = vmul.f32 1.442695, %v1680_v48 }
 0x563   : > { %4379 = vpow2.f32 %v1686_v49 }
 0x565   : > { %v4378_v45 = vpop.eup %4377 }
 0x566   : > { %v1690_v46 = vsel %vm1220_vm3, %v4378_v45, 0.0 }
 0x567   : > { %1691 = vadd.xlane.f32.xlu0 %v1690_v46 }
 0x56d   : > { %v4380_v57 = vpop.eup %4379 }
 0x56e   : > { %v1696_v58 = vsel %vm1220_vm3, %v4380_v57, 0.0 }
 0x57d   : > { %1715 = vrot.lane.b32.xlu0 %v5181_v20, %s4697_s0 }
 0x58f   : > { %v1671_v51 = vpop.xlane.xlu1 %1670 }
 0x590   : > { %v1679_v52 = vsub.f32 %v1556_v29, %v1671_v51 }
 0x592   : > { %v1684_v53 = vmul.f32 1.442695, %v1679_v52 }
 0x593   : > { %v1765_v54 = vpop.permute.xlu1 %1764 }
 0x594   : > { %4381 = vpow2.f32 %v1684_v53  ;;  %v1770_v55 = vsel %vm1272_vm2, %v1765_v54, 0 }
 0x595   : > { %4042 = vmatpush3.bf16.msra.mxu0 %v1770_v55 }
 0x596   : > { %4053 = vmatprep.subr.bf16.mxu0 %v4695_v37 }
 0x597   : > { %v1677_v63 = vpop.xlane.xlu0 %1676  ;;  %v1814_v14 = vpop.permute.xlu1 %1813 }
 0x598   : > { %v1681_v0 = vsub.f32 %v1660_v34, %v1677_v63  ;;  %v1819_v18 = vsel %vm1272_vm2, %v1814_v14, 0 }
 0x59a   : > { %v1688_v1 = vmul.f32 1.442695, %v1681_v0 }
 0x59b   : > { %v1863_v22 = vpop.permute.xlu1 %1862 }
 0x59c   : > { %1697 = vadd.xlane.f32.xlu0 %v1696_v58  ;;  %4383 = vpow2.f32 %v1688_v1  ;;  %v1868_v34 = vsel %vm1272_vm2, %v1863_v22, 0 }
 0x59e   : > { %v4382_v59 = vpop.eup %4381 }
 0x59f   : > { %v1693_v62 = vsel %vm1220_vm3, %v4382_v59, 0.0 }
 0x5a0   : > { %1694 = vadd.xlane.f32.xlu1 %v1693_v62 }
 0x5a6   : > { %v4384_v2 = vpop.eup %4383 }
 0x5a7   : > { %v1699_v6 = vsel %vm1220_vm3, %v4384_v2, 0.0 }
 0x5b1   : > { %1975 = vrot.lane.b32.xlu1 %v5137_v56, %s4698_s9 }
 0x5b2   : > { %1925 = vrot.lane.b32.xlu0 %v5132_v50, %s4698_s9 }
 0x5b6   : > { %1923 = vrot.lane.b32.xlu0 %v5139_v60, %s4698_s9 }
 0x5ba   : > { %2025 = vrot.lane.b32.xlu0 %v5141_v61, %s4698_s9 }
 0x5be   : > { %2023 = vrot.lane.b32.xlu0 %v5155_v4, %s4698_s9 }
 0x5d5   : > { %1700 = vadd.xlane.f32.xlu1 %v1699_v6 }
 0x5e6   : > { %1973 = vrot.lane.b32.xlu1 %v5157_v5, %s4698_s9 }
 0x5ea   : > { %2075 = vrot.lane.b32.xlu1 %v5149_v3, %s4698_s9 }
 0x5ee   : > { %2073 = vrot.lane.b32.xlu1 %v5170_v9, %s4698_s9 }
 0x5f4   : > { %v1692_v7 = vpop.xlane.xlu0 %1691 }
 0x5f5   : > { %4385 = vrcp.f32 %v1692_v7 }
 0x5f8   : > { %v1716_v10 = vpop.permute.xlu0 %1715 }
 0x5f9   : > { %v1721_v11 = vsel %vm1272_vm2, %v1716_v10, 0 }
 0x5fa   : > { %4036 = vmatpush3.bf16.msra.mxu1 %v1721_v11 }
 0x5fb   : > { %4047 = vmatprep.subr.bf16.mxu1 %v4695_v37 }
 0x5ff   : > { %v4386_v12 = vpop.eup %4385 }
 0x600   : > { %v1706_v13 = vmul.f32 %v4386_v12, %v4378_v45 }
 0x602   : > { %v1710_v15 = vpack.c.bf16 %v1706_v13, %v1706_v13 }
 0x604   : > { %4038 = vmatmul.mubr.msk.bf16.vlgmr.msra.gmra.mrb[24].mxu1 %vm1220_vm3, %v1710_v15 }
 0x605   : > { %4048 = vmatpush3.bf16.msra.mxu1 %v1819_v18  ;;  %4049 = vmatprep.mubr.msk.bf16.mxu1 %vm4696_vm0, %v4695_v37 }
 0x606   : > { %4059 = vmatprep.subr.bf16.mxu1 %v4695_v37 }
 0x629   : > { %v1698_v23 = vpop.xlane.xlu0 %1697 }
 0x62a   : > { %4387 = vrcp.f32 %v1698_v23 }
 0x62d   : > { %v1695_v24 = vpop.xlane.xlu1 %1694  ;;  %v1926_v25 = vpop.permute.xlu0 %1925 }
 0x62e   : > { %4389 = vrcp.f32 %v1695_v24  ;;  %v1931_v32 = vsel %vm1035_vm1, %v1926_v25, 0 }
 0x631   : > { %v1924_v30 = vpop.permute.xlu0 %1923  ;;  %v1976_v38 = vpop.permute.xlu1 %1975 }
 0x632   : > { %v1981_v47 = vsel %vm1035_vm1, %v1976_v38, 0 }
 0x634   : > { %v4388_v26 = vpop.eup %4387 }
 0x635   : > { %v1708_v27 = vmul.f32 %v4388_v26, %v4380_v57  ;;  %v2026_v17 = vpop.permute.xlu0 %2025 }
 0x636   : > { %v2031_v35 = vsel %vm1035_vm1, %v2026_v17, 0 }
 0x637   : > { %v1712_v28 = vpack.c.bf16 %v1708_v27, %v1708_v27 }
 0x638   : > { %v4390_v29 = vpop.eup %4389 }
 0x639   : > { %v1707_v31 = vmul.f32 %v4390_v29, %v4382_v59  ;;  %4050 = vmatmul.mubr.msk.bf16.vlgmr.msra.gmra.mrb[28].mxu1 %vm1220_vm3, %v1712_v28  ;;  %v2024_v36 = vpop.permute.xlu0 %2023 }
 0x63a   : > { %4060 = vmatpush3.bf16.xpose.msra.mxu1 %v1931_v32  ;;  %4061 = vmatprep.mubr.msk.bf16.mxu1 %vm4696_vm0, %v4695_v37 }
 0x63b   : > { %v1711_v33 = vpack.c.bf16 %v1707_v31, %v1707_v31  ;;  %4071 = vmatprep.subr.bf16.mxu1 %v4695_v37 }
 0x63d   : > { %4044 = vmatmul.mubr.msk.bf16.vlgmr.msra.gmra.mrb[36].mxu0 %vm1220_vm3, %v1711_v33 }
 0x63e   : > { %4054 = vmatpush3.bf16.msra.mxu0 %v1868_v34  ;;  %4055 = vmatprep.mubr.msk.bf16.mxu0 %vm4696_vm0, %v4695_v37 }
 0x63f   : > { %4065 = vmatprep.subr.bf16.mxu0 %v4695_v37 }
 0x641   : > { %4062 = vmatmul.mubr.msk.bf16.vlgmr.msra.gmra.mrb[32].mxu1 %vm1035_vm1, %v1924_v30 }
 0x642   : > { %4072 = vmatpush3.bf16.xpose.msra.mxu1 %v2031_v35  ;;  %4073 = vmatprep.mubr.msk.bf16.mxu1 %vm4696_vm0, %v4695_v37 }
 0x643   : > { %4083 = vmatprep.subr.bf16.mxu1 %v4695_v37 }
 0x649   : > { %4074 = vmatmul.mubr.msk.bf16.vlgmr.msra.gmra.mrb[36].mxu1 %vm1035_vm1, %v2024_v36 }
 0x64a   : > { %4085 = vmatprep.mubr.msk.bf16.mxu1 %vm4696_vm0, %v4695_v37 }
 0x662   : > { %v1701_v41 = vpop.xlane.xlu1 %1700 }
 0x663   : > { %4391 = vrcp.f32 %v1701_v41 }
 0x666   : > { %v1974_v46 = vpop.permute.xlu1 %1973 }
 0x66a   : > { %v2076_v48 = vpop.permute.xlu1 %2075 }
 0x66b   : > { %v2081_v49 = vsel %vm1035_vm1, %v2076_v48, 0 }
 0x66d   : > { %v4392_v42 = vpop.eup %4391 }
 0x66e   : > { %v1709_v44 = vmul.f32 %v4392_v42, %v4384_v2  ;;  %v2074_v51 = vpop.permute.xlu1 %2073 }
 0x670   : > { %v1713_v45 = vpack.c.bf16 %v1709_v44, %v1709_v44 }
 0x672   : > { %4056 = vmatmul.mubr.msk.bf16.vlgmr.msra.gmra.mrb[40].mxu0 %vm1220_vm3, %v1713_v45 }
 0x673   : > { %4066 = vmatpush3.bf16.xpose.msra.mxu0 %v1981_v47  ;;  %4067 = vmatprep.mubr.msk.bf16.mxu0 %vm4696_vm0, %v4695_v37 }
 0x674   : > { %4077 = vmatprep.subr.bf16.mxu0 %v4695_v37 }
 0x67a   : > { %4068 = vmatmul.mubr.msk.bf16.vlgmr.msra.gmra.mrb[44].mxu0 %vm1035_vm1, %v1974_v46 }
 0x67b   : > { %4078 = vmatpush3.bf16.xpose.msra.mxu0 %v2081_v49  ;;  %4079 = vmatprep.mubr.msk.bf16.mxu0 %vm4696_vm0, %v4695_v37 }
 0x67c   : > { %4089 = vmatprep.subr.bf16.mxu0 %v4695_v37 }
 0x682   : > { %4080 = vmatmul.mubr.msk.bf16.vlgmr.msra.gmra.mrb[48].mxu0 %vm1035_vm1, %v2074_v51 }
 0x683   : > { %4091 = vmatprep.mubr.msk.bf16.mxu0 %vm4696_vm0, %v4695_v37 }
 0x6d7   : > { %v5335_v52 = vpop.f32.mrb[24].mxu1 }
 0x6d8   : > { %v4039_v53 = vpop.f32.mrb[25].mxu1 }
 0x6d9   : > { %v1760_v54 = vpop.f32.mrb[26].mxu1 }
 0x6da   : > { %v4040_v55 = vpop.f32.mrb[27].mxu1 }
 0x70c   : > { %v5337_v57 = vpop.f32.mrb[28].mxu1 }
 0x70d   : > { %v4051_v58 = vpop.f32.mrb[29].mxu1 }
 0x70e   : > { %v1858_v59 = vpop.f32.mrb[30].mxu1 }
 0x70f   : > { %v4052_v62 = vpop.f32.mrb[31].mxu1 }
 0x710   : > { %v5339_v63 = vpop.f32.mrb[36].mxu0 }
 0x711   : > { %v1910_v0 = vpack.c.bf16 %v5339_v63, %v5335_v52  ;;  %v4045_v1 = vpop.f32.mrb[37].mxu0 }
 0x712   : > { %v1809_v2 = vpop.f32.mrb[38].mxu0 }
 0x713   : > { %v4046_v6 = vpop.f32.mrb[39].mxu0 }
 0x714   : > { %v1967_v7 = vpop.f32.mrb[32].mxu1 }
 0x715   : > { %v4063_v10 = vpop.f32.mrb[33].mxu1  ;;  %v2123_v11 = vsel %vm1220_vm3, %v1967_v7, -inf }
 0x716   : > { %2124 = vmax.xlane.f32.xlu0 %v2123_v11  ;;  %v1970_v12 = vpop.f32.mrb[34].mxu1 }
 0x717   : > { %v4064_v13 = vpop.f32.mrb[35].mxu1 }
 0x71c   : > { %v2067_v14 = vpop.f32.mrb[36].mxu1 }
 0x71d   : > { %v4075_v15 = vpop.f32.mrb[37].mxu1  ;;  %v2129_v18 = vsel %vm1220_vm3, %v2067_v14, -inf }
 0x71e   : > { %2130 = vmax.xlane.f32.xlu0 %v2129_v18  ;;  %v2070_v22 = vpop.f32.mrb[38].mxu1 }
 0x71f   : > { %v4076_v23 = vpop.f32.mrb[39].mxu1 }
 0x745   : > { %v5345_v24 = vpop.f32.mrb[40].mxu0 }
 0x746   : > { %v1911_v25 = vpack.c.bf16 %v5345_v24, %v5337_v57  ;;  %v4057_v26 = vpop.f32.mrb[41].mxu0 }
 0x747   : > { %v1907_v27 = vpop.f32.mrb[42].mxu0 }
 0x748   : > { %v4058_v28 = vpop.f32.mrb[43].mxu0 }
 0x74d   : > { %v2017_v29 = vpop.f32.mrb[44].mxu0 }
 0x74e   : > { %v4069_v30 = vpop.f32.mrb[45].mxu0  ;;  %v2126_v31 = vsel %vm1220_vm3, %v2017_v29, -inf }
 0x74f   : > { %2127 = vmax.xlane.f32.xlu1 %v2126_v31  ;;  %v2020_v32 = vpop.f32.mrb[46].mxu0 }
 0x750   : > { %v4070_v33 = vpop.f32.mrb[47].mxu0 }
 0x755   : > { %v2117_v34 = vpop.f32.mrb[48].mxu0 }
 0x756   : > { %v4081_v17 = vpop.f32.mrb[49].mxu0  ;;  %v2132_v35 = vsel %vm1220_vm3, %v2117_v34, -inf }
 0x757   : > { %2133 = vmax.xlane.f32.xlu0 %v2132_v35  ;;  %v2120_v36 = vpop.f32.mrb[50].mxu0 }
 0x758   : > { %v4082_v38 = vpop.f32.mrb[51].mxu0 }
 0x760   : > { %2219 = vrot.lane.b32.xlu1 %v5183_v21, %s4698_s9 }
 0x764   : > { %2267 = vrot.lane.b32.xlu1 %v5217_v19, %s4698_s9 }
 0x768   : > { %2315 = vrot.lane.b32.xlu1 %v5227_v16, %s4698_s9 }
 0x7a3   : > { %v2125_v41 = vpop.xlane.xlu0 %2124 }
 0x7a4   : > { %v2135_v42 = vsub.f32 %v1967_v7, %v2125_v41 }
 0x7a6   : > { %v2139_v44 = vmul.f32 1.442695, %v2135_v42 }
 0x7a8   : > { %4393 = vpow2.f32 %v2139_v44 }
 0x7ab   : > { %v2131_v47 = vpop.xlane.xlu0 %2130 }
 0x7ac   : > { %v2137_v48 = vsub.f32 %v2067_v14, %v2131_v47 }
 0x7ae   : > { %v2143_v49 = vmul.f32 1.442695, %v2137_v48 }
 0x7b0   : > { %4395 = vpow2.f32 %v2143_v49 }
 0x7b2   : > { %v4394_v45 = vpop.eup %4393 }
 0x7b3   : > { %v2147_v46 = vsel %vm1220_vm3, %v4394_v45, 0.0 }
 0x7b4   : > { %2148 = vadd.xlane.f32.xlu0 %v2147_v46 }
 0x7ba   : > { %v4396_v59 = vpop.eup %4395 }
 0x7bb   : > { %v2153_v62 = vsel %vm1220_vm3, %v4396_v59, 0.0 }
 0x7ca   : > { %2171 = vrot.lane.b32.xlu0 %v5181_v20, %s4698_s9 }
 0x7dc   : > { %v2128_v51 = vpop.xlane.xlu1 %2127 }
 0x7dd   : > { %v2136_v53 = vsub.f32 %v2017_v29, %v2128_v51 }
 0x7df   : > { %v2141_v54 = vmul.f32 1.442695, %v2136_v53 }
 0x7e0   : > { %v2220_v55 = vpop.permute.xlu1 %2219 }
 0x7e1   : > { %4397 = vpow2.f32 %v2141_v54  ;;  %v2225_v58 = vsel %vm1272_vm2, %v2220_v55, 0 }
 0x7e2   : > { %4090 = vmatpush3.bf16.msra.mxu0 %v2225_v58 }
 0x7e3   : > { %4101 = vmatprep.subr.bf16.mxu0 %v4695_v37 }
 0x7e4   : > { %v2134_v6 = vpop.xlane.xlu0 %2133  ;;  %v2268_v13 = vpop.permute.xlu1 %2267 }
 0x7e5   : > { %v2138_v7 = vsub.f32 %v2117_v34, %v2134_v6 }
 0x7e7   : > { %v2145_v10 = vmul.f32 1.442695, %v2138_v7 }
 0x7e9   : > { %2154 = vadd.xlane.f32.xlu0 %v2153_v62  ;;  %4399 = vpow2.f32 %v2145_v10 }
 0x7eb   : > { %v4398_v1 = vpop.eup %4397 }
 0x7ec   : > { %v2150_v2 = vsel %vm1220_vm3, %v4398_v1, 0.0 }
 0x7ed   : > { %2151 = vadd.xlane.f32.xlu1 %v2150_v2 }
 0x7f3   : > { %v4400_v11 = vpop.eup %4399 }
 0x7f4   : > { %v2156_v12 = vsel %vm1220_vm3, %v4400_v11, 0.0 }
 0x7fe   : > { %2428 = vrot.lane.b32.xlu1 %v5137_v56, %s4699_s26 }
 0x7ff   : > { %2378 = vrot.lane.b32.xlu0 %v5132_v50, %s4699_s26 }
 0x803   : > { %2376 = vrot.lane.b32.xlu0 %v5139_v60, %s4699_s26 }
 0x807   : > { %2478 = vrot.lane.b32.xlu0 %v5141_v61, %s4699_s26 }
 0x80b   : > { %2476 = vrot.lane.b32.xlu0 %v5155_v4, %s4699_s26 }
 0x822   : > { %2157 = vadd.xlane.f32.xlu1 %v2156_v12 }
 0x833   : > { %2426 = vrot.lane.b32.xlu1 %v5157_v5, %s4699_s26  ;;  %v2273_v5 = vsel %vm1272_vm2, %v2268_v13, 0 }
 0x837   : > { %2528 = vrot.lane.b32.xlu1 %v5149_v3, %s4699_s26  ;;  %v2316_v3 = vpop.permute.xlu1 %2315 }
 0x838   : > { %v2321_v32 = vsel %vm1272_vm2, %v2316_v3, 0 }
 0x83b   : > { %2526 = vrot.lane.b32.xlu1 %v5170_v9, %s4699_s26 }
 0x841   : > { %v2149_v50 = vpop.xlane.xlu0 %2148 }
 0x842   : > { %4401 = vrcp.f32 %v2149_v50 }
 0x845   : > { %v2172_v56 = vpop.permute.xlu0 %2171 }
 0x846   : > { %v2177_v60 = vsel %vm1272_vm2, %v2172_v56, 0 }
 0x847   : > { %4084 = vmatpush3.bf16.msra.mxu1 %v2177_v60 }
 0x848   : > { %4095 = vmatprep.subr.bf16.mxu1 %v4695_v37 }
 0x84c   : > { %v4402_v61 = vpop.eup %4401 }
 0x84d   : > { %v2163_v4 = vmul.f32 %v4402_v61, %v4394_v45 }
 0x84f   : > { %v2167_v14 = vpack.c.bf16 %v2163_v4, %v2163_v4 }
 0x851   : > { %4086 = vmatmul.mubr.msk.bf16.vlgmr.msra.gmra.mrb[40].mxu1 %vm1220_vm3, %v2167_v14 }
 0x852   : > { %4096 = vmatpush3.bf16.msra.mxu1 %v2273_v5  ;;  %4097 = vmatprep.mubr.msk.bf16.mxu1 %vm4696_vm0, %v4695_v37 }
 0x853   : > { %4107 = vmatprep.subr.bf16.mxu1 %v4695_v37 }
 0x876   : > { %v2155_v9 = vpop.xlane.xlu0 %2154 }
 0x877   : > { %4403 = vrcp.f32 %v2155_v9 }
 0x87a   : > { %v2152_v15 = vpop.xlane.xlu1 %2151  ;;  %v2379_v18 = vpop.permute.xlu0 %2378 }
 0x87b   : > { %4405 = vrcp.f32 %v2152_v15  ;;  %v2384_v30 = vsel %vm1035_vm1, %v2379_v18, 0 }
 0x87e   : > { %v2377_v28 = vpop.permute.xlu0 %2376  ;;  %v2429_v35 = vpop.permute.xlu1 %2428 }
 0x87f   : > { %v2434_v45 = vsel %vm1035_vm1, %v2429_v35, 0 }
 0x881   : > { %v4404_v22 = vpop.eup %4403 }
 0x882   : > { %v2165_v23 = vmul.f32 %v4404_v22, %v4396_v59  ;;  %v2479_v33 = vpop.permute.xlu0 %2478 }
 0x883   : > { %v2484_v34 = vsel %vm1035_vm1, %v2479_v33, 0 }
 0x884   : > { %v2169_v26 = vpack.c.bf16 %v2165_v23, %v2165_v23 }
 0x885   : > { %v4406_v27 = vpop.eup %4405 }
 0x886   : > { %v2164_v29 = vmul.f32 %v4406_v27, %v4398_v1  ;;  %4098 = vmatmul.mubr.msk.bf16.vlgmr.msra.gmra.mrb[44].mxu1 %vm1220_vm3, %v2169_v26  ;;  %v2477_v17 = vpop.permute.xlu0 %2476 }
 0x887   : > { %4108 = vmatpush3.bf16.xpose.msra.mxu1 %v2384_v30  ;;  %4109 = vmatprep.mubr.msk.bf16.mxu1 %vm4696_vm0, %v4695_v37 }
 0x888   : > { %v2168_v31 = vpack.c.bf16 %v2164_v29, %v2164_v29  ;;  %4119 = vmatprep.subr.bf16.mxu1 %v4695_v37 }
 0x88a   : > { %4092 = vmatmul.mubr.msk.bf16.vlgmr.msra.gmra.mrb[52].mxu0 %vm1220_vm3, %v2168_v31 }
 0x88b   : > { %4102 = vmatpush3.bf16.msra.mxu0 %v2321_v32  ;;  %4103 = vmatprep.mubr.msk.bf16.mxu0 %vm4696_vm0, %v4695_v37 }
 0x88c   : > { %4113 = vmatprep.subr.bf16.mxu0 %v4695_v37 }
 0x88e   : > { %4110 = vmatmul.mubr.msk.bf16.vlgmr.msra.gmra.mrb[48].mxu1 %vm1035_vm1, %v2377_v28 }
 0x88f   : > { %4120 = vmatpush3.bf16.xpose.msra.mxu1 %v2484_v34  ;;  %4121 = vmatprep.mubr.msk.bf16.mxu1 %vm4696_vm0, %v4695_v37 }
 0x890   : > { %4131 = vmatprep.subr.bf16.mxu1 %v4695_v37 }
 0x896   : > { %4122 = vmatmul.mubr.msk.bf16.vlgmr.msra.gmra.mrb[52].mxu1 %vm1035_vm1, %v2477_v17 }
 0x897   : > { %4133 = vmatprep.mubr.msk.bf16.mxu1 %vm4696_vm0, %v4695_v37 }
 0x8af   : > { %v2158_v36 = vpop.xlane.xlu1 %2157 }
 0x8b0   : > { %4407 = vrcp.f32 %v2158_v36 }
 0x8b3   : > { %v2427_v44 = vpop.permute.xlu1 %2426 }
 0x8b7   : > { %v2529_v46 = vpop.permute.xlu1 %2528 }
 0x8b8   : > { %v2534_v47 = vsel %vm1035_vm1, %v2529_v46, 0 }
 0x8ba   : > { %v4408_v38 = vpop.eup %4407 }
 0x8bb   : > { %v2166_v41 = vmul.f32 %v4408_v38, %v4400_v11  ;;  %v2527_v48 = vpop.permute.xlu1 %2526 }
 0x8bd   : > { %v2170_v42 = vpack.c.bf16 %v2166_v41, %v2166_v41 }
 0x8bf   : > { %4104 = vmatmul.mubr.msk.bf16.vlgmr.msra.gmra.mrb[56].mxu0 %vm1220_vm3, %v2170_v42 }
 0x8c0   : > { %4114 = vmatpush3.bf16.xpose.msra.mxu0 %v2434_v45  ;;  %4115 = vmatprep.mubr.msk.bf16.mxu0 %vm4696_vm0, %v4695_v37 }
 0x8c1   : > { %4125 = vmatprep.subr.bf16.mxu0 %v4695_v37 }
 0x8c7   : > { %4116 = vmatmul.mubr.msk.bf16.vlgmr.msra.gmra.mrb[60].mxu0 %vm1035_vm1, %v2427_v44 }
 0x8c8   : > { %4126 = vmatpush3.bf16.xpose.msra.mxu0 %v2534_v47  ;;  %4127 = vmatprep.mubr.msk.bf16.mxu0 %vm4696_vm0, %v4695_v37 }
 0x8c9   : > { %4137 = vmatprep.subr.bf16.mxu0 %v4695_v37 }
 0x8cf   : > { %4128 = vmatmul.mubr.msk.bf16.vlgmr.msra.gmra.mrb[64].mxu0 %vm1035_vm1, %v2527_v48 }
 0x8d0   : > { %4139 = vmatprep.mubr.msk.bf16.mxu0 %vm4696_vm0, %v4695_v37 }
 0x924   : > { %v2213_v49 = vpop.f32.mrb[40].mxu1 }
 0x925   : > { %v4087_v51 = vpop.f32.mrb[41].mxu1 }
 0x926   : > { %v2216_v53 = vpop.f32.mrb[42].mxu1 }
 0x927   : > { %v4088_v54 = vpop.f32.mrb[43].mxu1 }
 0x959   : > { %v5419_v55 = vpop.f32.mrb[44].mxu1 }
 0x95a   : > { %v4099_v58 = vpop.f32.mrb[45].mxu1 }
 0x95b   : > { %v2312_v59 = vpop.f32.mrb[46].mxu1 }
 0x95c   : > { %v4100_v62 = vpop.f32.mrb[47].mxu1 }
 0x95d   : > { %v2261_v1 = vpop.f32.mrb[52].mxu0 }
 0x95e   : > { %v2363_v2 = vpack.c.bf16 %v2261_v1, %v2213_v49  ;;  %v4093_v6 = vpop.f32.mrb[53].mxu0 }
 0x95f   : > { %v2264_v7 = vpop.f32.mrb[54].mxu0 }
 0x960   : > { %v4094_v10 = vpop.f32.mrb[55].mxu0 }
 0x961   : > { %v2420_v11 = vpop.f32.mrb[48].mxu1 }
 0x962   : > { %v4111_v12 = vpop.f32.mrb[49].mxu1  ;;  %v2576_v50 = vsel %vm1220_vm3, %v2420_v11, -inf }
 0x963   : > { %2577 = vmax.xlane.f32.xlu0 %v2576_v50  ;;  %v2423_v56 = vpop.f32.mrb[50].mxu1 }
 0x964   : > { %v4112_v60 = vpop.f32.mrb[51].mxu1 }
 0x969   : > { %v2520_v61 = vpop.f32.mrb[52].mxu1 }
 0x96a   : > { %v4123_v4 = vpop.f32.mrb[53].mxu1  ;;  %v2582_v13 = vsel %vm1220_vm3, %v2520_v61, -inf }
 0x96b   : > { %2583 = vmax.xlane.f32.xlu0 %v2582_v13  ;;  %v2523_v14 = vpop.f32.mrb[54].mxu1 }
 0x96c   : > { %v4124_v5 = vpop.f32.mrb[55].mxu1 }
 0x992   : > { %v2357_v3 = vpop.f32.mrb[56].mxu0 }
 0x993   : > { %v2364_v9 = vpack.c.bf16 %v2357_v3, %v5419_v55  ;;  %v4105_v15 = vpop.f32.mrb[57].mxu0 }
 0x994   : > { %v2360_v18 = vpop.f32.mrb[58].mxu0 }
 0x995   : > { %v4106_v22 = vpop.f32.mrb[59].mxu0 }
 0x99a   : > { %v2470_v23 = vpop.f32.mrb[60].mxu0 }
 0x99b   : > { %v4117_v26 = vpop.f32.mrb[61].mxu0  ;;  %v2579_v27 = vsel %vm1220_vm3, %v2470_v23, -inf }
 0x99c   : > { %2580 = vmax.xlane.f32.xlu1 %v2579_v27  ;;  %v2473_v28 = vpop.f32.mrb[62].mxu0 }
 0x99d   : > { %v4118_v29 = vpop.f32.mrb[63].mxu0 }
 0x99e   : > { %v4313_v29 = vld [vmem:[%s5040_s24] sm:$0xff]  }
 0x9a2   : > { %v2570_v30 = vpop.f32.mrb[64].mxu0 }
 0x9a3   : > { %v4129_v31 = vpop.f32.mrb[65].mxu0  ;;  %v2585_v32 = vsel %vm1220_vm3, %v2570_v30, -inf }
 0x9a4   : > { %2586 = vmax.xlane.f32.xlu0 %v2585_v32  ;;  %v2573_v33 = vpop.f32.mrb[66].mxu0 }
 0x9a5   : > { %v4130_v34 = vpop.f32.mrb[67].mxu0 }
 0x9f0   : > { %v2578_v17 = vpop.xlane.xlu0 %2577 }
 0x9f1   : > { %v2588_v35 = vsub.f32 %v2420_v11, %v2578_v17 }
 0x9f3   : > { %v2592_v36 = vmul.f32 1.442695, %v2588_v35 }
 0x9f5   : > { %4409 = vpow2.f32 %v2592_v36  ;;  %v4315_v36 = vld [vmem:[%s5040_s24 + $0x10] sm:$0xff]  }
 0x9f8   : > { %v2584_v38 = vpop.xlane.xlu0 %2583 }
 0x9f9   : > { %v2590_v41 = vsub.f32 %v2520_v61, %v2584_v38 }
 0x9fb   : > { %v2596_v42 = vmul.f32 1.442695, %v2590_v41  ;;  %v4316_v41 = vld [vmem:[%s5040_s24 + $0x18] sm:$0xff]  }
 0x9fd   : > { %4411 = vpow2.f32 %v2596_v42  ;;  %v4317_v42 = vld [vmem:[%s5040_s24 + $0x20] sm:$0xff]  }
 0x9ff   : > { %v4410_v44 = vpop.eup %4409 }
 0xa00   : > { %v2600_v45 = vsel %vm1220_vm3, %v4410_v44, 0.0 }
 0xa01   : > { %2601 = vadd.xlane.f32.xlu0 %v2600_v45  ;;  %v4319_v45 = vld [vmem:[%s5040_s24 + $0x30] sm:$0xff]  }
 0xa07   : > { %v4412_v46 = vpop.eup %4411 }
 0xa08   : > { %v2606_v47 = vsel %vm1220_vm3, %v4412_v46, 0.0 }
 0xa09   : > { %2607 = vadd.xlane.f32.xlu0 %v2606_v47 }
 0xa1f   : > { %2624 = vrot.lane.b32.xlu0 %v5181_v20, %s4699_s26 }
 0xa23   : > { %1914 = vrot.lane.b32.xlu0 %v1910_v0, %s4699_s26 }
 0xa27   : > { %2367 = vrot.lane.b32.xlu0 %v2363_v2, %s4698_s9 }
 0xa29   : > { %v2581_v48 = vpop.xlane.xlu1 %2580 }
 0xa2a   : > { %v2589_v49 = vsub.f32 %v2470_v23, %v2581_v48 }
 0xa2c   : > { %v2594_v51 = vmul.f32 1.442695, %v2589_v49 }
 0xa2e   : > { %4413 = vpow2.f32 %v2594_v51 }
 0xa31   : > { %v2587_v20 = vpop.xlane.xlu0 %2586 }
 0xa32   : > { %v2591_v55 = vsub.f32 %v2570_v30, %v2587_v20  ;;  %v4314_v30 = vld [vmem:[%s5040_s24 + $0x8] sm:$0xff]  }
 0xa34   : > { %v2598_v52 = vmul.f32 1.442695, %v2591_v55 }
 0xa36   : > { %4415 = vpow2.f32 %v2598_v52 }
 0xa38   : > { %v4414_v53 = vpop.eup %4413 }
 0xa39   : > { %v2603_v54 = vsel %vm1220_vm3, %v4414_v53, 0.0 }
 0xa3a   : > { %2604 = vadd.xlane.f32.xlu1 %v2603_v54 }
 0xa40   : > { %v4416_v63 = vpop.eup %4415 }
 0xa41   : > { %v2609_v0 = vsel %vm1220_vm3, %v4416_v63, 0.0 }
 0xa4b   : > { %2672 = vrot.lane.b32.xlu1 %v5183_v21, %s4699_s26 }
 0xa4f   : > { %2720 = vrot.lane.b32.xlu1 %v5217_v19, %s4699_s26 }
 0xa73   : > { %2610 = vadd.xlane.f32.xlu1 %v2609_v0 }
 0xa84   : > { %2768 = vrot.lane.b32.xlu1 %v5227_v16, %s4699_s26 }
 0xa88   : > { %1916 = vrot.lane.b32.xlu1 %v1911_v25, %s4699_s26 }
 0xa8c   : > { %2369 = vrot.lane.b32.xlu1 %v2364_v9, %s4698_s9 }
 0xa8e   : > { %v2602_v21 = vpop.xlane.xlu0 %2601 }
 0xa8f   : > { %4417 = vrcp.f32 %v2602_v21 }
 0xa96   : > { %v2608_v19 = vpop.xlane.xlu0 %2607 }
 0xa97   : > { %4419 = vrcp.f32 %v2608_v19 }
 0xa99   : > { %v4418_v58 = vpop.eup %4417 }
 0xa9a   : > { %v2616_v59 = vmul.f32 %v4418_v58, %v4410_v44  ;;  %v2625_v62 = vpop.permute.xlu0 %2624  ;;  %v4318_v44 = vld [vmem:[%s5040_s24 + $0x28] sm:$0xff]  }
 0xa9b   : > { %v2630_v1 = vsel %vm1272_vm2, %v2625_v62, 0 }
 0xa9c   : > { %4132 = vmatpush3.bf16.msra.mxu1 %v2630_v1  ;;  %v2620_v2 = vpack.c.bf16 %v2616_v59, %v2616_v59 }
 0xa9d   : > { %4143 = vmatprep.subr.bf16.mxu1 %v4695_v37 }
 0xa9e   : > { %v1915_v16 = vpop.permute.xlu0 %1914 }
 0xa9f   : > { %1921 = vst.msk [vmem:[#allocation3] sm:$0xff] %vm1920_vm4, %v1915_v16  ;;  %4134 = vmatmul.mubr.msk.bf16.vlgmr.msra.gmra.mrb[56].mxu1 %vm1220_vm3, %v2620_v2  ;;  %v4441_v2 = vld [vmem:[#allocation2] sm:$0xff] }
 0xaa0   : > { %4145 = vmatprep.mubr.msk.bf16.mxu1 %vm4696_vm0, %v4695_v37 }
 0xaa1   : > { %v4420_v25 = vpop.eup %4419 }
 0xaa2   : > { %v2368_v57 = vpop.permute.xlu0 %2367  ;;  %v2618_v10 = vmul.f32 %v4420_v25, %v4412_v46  ;;  %v4320_v46 = vld [vmem:[%s5040_s24 + $0x38] sm:$0xff]   ;;  %s5690_s24 = scalar_lea.vmem %s5627_s4, %s5050_s8 }
 0xaa3   : > { %2374 = vst.msk [vmem:[#allocation3] sm:$0xff] %vm2373_vm5, %v2368_v57  ;;  %v4442_v57 = vld [vmem:[#allocation2 + $0x8] sm:$0xff] }
 0xaa4   : > { %v2622_v56 = vpack.c.bf16 %v2618_v10, %v2618_v10  ;;  %v4444_v10 = vld [vmem:[#allocation2 + $0x18] sm:$0xff] }
 0xac7   : > { %v2605_v24 = vpop.xlane.xlu1 %2604 }
 0xac8   : > { %4421 = vrcp.f32 %v2605_v24 }
 0xacb   : > { %v2673_v6 = vpop.permute.xlu1 %2672 }
 0xacc   : > { %v2678_v7 = vsel %vm1272_vm2, %v2673_v6, 0  ;;  %v4443_v6 = vld [vmem:[#allocation2 + $0x10] sm:$0xff] }
 0xacd   : > { %4138 = vmatpush3.bf16.msra.mxu0 %v2678_v7 }
 0xace   : > { %4149 = vmatprep.subr.bf16.mxu0 %v4695_v37 }
 0xacf   : > { %v2721_v11 = vpop.permute.xlu1 %2720 }
 0xad0   : > { %v2726_v12 = vsel %vm1272_vm2, %v2721_v11, 0 }
 0xad1   : > { %4144 = vmatpush3.bf16.msra.mxu1 %v2726_v12  ;;  %v4321_v12 = vld [vmem:[%s5042_s2] ss:$8 sps:$4 sm:$0xff]  }
 0xad2   : > { %v4422_v50 = vpop.eup %4421  ;;  %4155 = vmatprep.subr.bf16.mxu1 %v4313_v29 }
 0xad3   : > { %v2617_v60 = vmul.f32 %v4422_v50, %v4414_v53  ;;  %v4323_v50 = vld [vmem:[%s5042_s2 + $0x4] ss:$8 sps:$4 sm:$0xff]  }
 0xad4   : > { %4146 = vmatmul.mubr.msk.bf16.vlgmr.msra.gmra.mrb[60].mxu1 %vm1220_vm3, %v2622_v56  ;;  %v4326_v56 = vld [vmem:[%s5042_s2 + $0x14] ss:$8 sps:$4 sm:$0xff]  }
 0xad5   : > { %v2621_v61 = vpack.c.bf16 %v2617_v60, %v2617_v60  ;;  %4156 = vmatpush3.bf16.msra.mxu1 %v4313_v29  ;;  %v4324_v60 = vld [vmem:[%s5042_s2 + $0x10] ss:$8 sps:$4 sm:$0xff]  }
 0xad6   : > { %4157 = vmatprep.subr.bf16.mxu1 %v4314_v30 }
 0xad7   : > { %4140 = vmatmul.mubr.msk.bf16.vlgmr.msra.gmra.mrb[68].mxu0 %vm1220_vm3, %v2621_v61 }
 0xad8   : > { %4151 = vmatprep.mubr.msk.bf16.mxu0 %vm4696_vm0, %v4695_v37 }
 0xad9   : > { %4158 = vmatpush3.bf16.msra.mxu1 %v4314_v30  ;;  %v4329_v30 = vld [vmem:[%s5042_s2 + $0x24] ss:$8 sps:$4 sm:$0xff]  }
 0xada   : > { %4159 = vmatprep.subr.bf16.mxu1 %v4315_v36 }
 0xadd   : > { %4160 = vmatpush3.bf16.msra.mxu1 %v4315_v36  ;;  %v4336_v36 = vld [vmem:[%s5042_s2 + $0x50] ss:$8 sps:$4 sm:$0xff]  }
 0xade   : > { %4161 = vmatprep.subr.bf16.mxu1 %v4316_v41 }
 0xae1   : > { %4162 = vmatpush3.bf16.msra.mxu1 %v4316_v41  ;;  %v4339_v41 = vld [vmem:[%s5042_s2 + $0x60] ss:$8 sps:$4 sm:$0xff]  }
 0xae2   : > { %4163 = vmatprep.subr.bf16.mxu1 %v4317_v42 }
 0xae5   : > { %4164 = vmatpush3.bf16.msra.mxu1 %v4317_v42  ;;  %v4344_v42 = vld [vmem:[%s5042_s2 + $0x74] ss:$8 sps:$4 sm:$0xff]  }
 0xae6   : > { %4165 = vmatprep.subr.bf16.mxu1 %v4318_v44 }
 0xae9   : > { %4166 = vmatpush3.bf16.msra.mxu1 %v4318_v44  ;;  %v4342_v44 = vld [vmem:[%s5042_s2 + $0x70] ss:$8 sps:$4 sm:$0xff]  }
 0xaea   : > { %4167 = vmatprep.subr.bf16.mxu1 %v4319_v45 }
 0xaed   : > { %4168 = vmatpush3.bf16.msra.mxu1 %v4319_v45  ;;  %v4345_v45 = vld [vmem:[%s5088_s17 + $0x40] sm:$0xff]  }
 0xaee   : > { %4169 = vmatprep.subr.bf16.mxu1 %v4320_v46 }
 0xaf1   : > { %4170 = vmatpush3.bf16.msra.mxu1 %v4320_v46  ;;  %v4346_v46 = vld [vmem:[%s5088_s17] sm:$0xff]  }
 0xaf2   : > { %3915 = vmatprep.subr.bf16.mxu1 %v4345_v45 }
 0xb00   : > { %v2611_v4 = vpop.xlane.xlu1 %2610 }
 0xb01   : > { %4423 = vrcp.f32 %v2611_v4 }
 0xb04   : > { %v2769_v13 = vpop.permute.xlu1 %2768 }
 0xb05   : > { %v2774_v14 = vsel %vm1272_vm2, %v2769_v13, 0 }
 0xb06   : > { %4150 = vmatpush3.bf16.msra.mxu0 %v2774_v14 }
 0xb07   : > { %3132 = vmatprep.subr.bf16.mxu0 %v4323_v50 }
 0xb08   : > { %v1917_v5 = vpop.permute.xlu1 %1916 }
 0xb09   : > { %1922 = vst.msk [vmem:[#allocation3 + $0x8] sm:$0xff] %vm1920_vm4, %v1917_v5 }
 0xb0b   : > { %v4424_v3 = vpop.eup %4423 }
 0xb0c   : > { %v2619_v9 = vmul.f32 %v4424_v3, %v4416_v63  ;;  %v2370_v15 = vpop.permute.xlu1 %2369  ;;  %v3768_v63 = vld [vmem:[%s5690_s24] ss:$0 sm:$0xff] }
 0xb0d   : > { %2375 = vst.msk [vmem:[#allocation3 + $0x8] sm:$0xff] %vm2373_vm5, %v2370_v15 }
 0xb0e   : > { %v2623_v18 = vpack.c.bf16 %v2619_v9, %v2619_v9 }
 0xb10   : > { %4152 = vmatmul.mubr.msk.bf16.vlgmr.msra.gmra.mrb[72].mxu0 %vm1220_vm3, %v2623_v18 }
 0xb11   : > { %3164 = vmatprep.mubr.bf16.mxu0 %v4694_v8  ;;  %3133 = vmatpush1.bf16.msra.mxu0 %v4321_v12 }
 0xb12   : > { %3134 = vmatprep.subr.bf16.mxu0 %v4326_v56  ;;  %v3778_v56 = vld [vmem:[%s5692_s19] ss:$0 sm:$0xff] }
 0xb15   : > { %3135 = vmatpush1.bf16.msra.mxu0 %v4324_v60 }
 0xb16   : > { %3136 = vmatprep.subr.bf16.mxu0 %v4329_v30  ;;  %v3040_v30 = vld [vmem:[%s5074_s3] sm:$0x3] }
 0xb72   : > { %v2666_v37 = vpop.f32.mrb[56].mxu1 }
 0xb73   : > { %v4135_v22 = vpop.f32.mrb[57].mxu1 }
 0xb74   : > { %v2669_v23 = vpop.f32.mrb[58].mxu1 }
 0xb75   : > { %v4136_v26 = vpop.f32.mrb[59].mxu1 }
 0xba7   : > { %v2762_v27 = vpop.f32.mrb[60].mxu1 }
 0xba8   : > { %v4147_v28 = vpop.f32.mrb[61].mxu1 }
 0xba9   : > { %v2765_v31 = vpop.f32.mrb[62].mxu1 }
 0xbaa   : > { %v2714_v32 = vpop.f32.mrb[68].mxu0  ;;  %v4148_v33 = vpop.f32.mrb[63].mxu1  ;;  %v4327_v31 = vld [vmem:[%s5042_s2 + $0x20] ss:$8 sps:$4 sm:$0xff]  }
 0xbab   : > { %v2816_v34 = vpack.c.bf16 %v2714_v32, %v2666_v37  ;;  %v4141_v17 = vpop.f32.mrb[69].mxu0  ;;  %3137 = vmatpush1.bf16.msra.mxu0 %v4327_v31  ;;  %v4332_v32 = vld [vmem:[%s5042_s2 + $0x34] ss:$8 sps:$4 sm:$0xff]   ;;  %v4330_v33 = vld [vmem:[%s5042_s2 + $0x30] ss:$8 sps:$4 sm:$0xff]   ;;  %v3049_v31 = vrot.slane %v3040_v30, %v784_v40 }
 0xbac   : > { %v2717_v35 = vpop.f32.mrb[70].mxu0  ;;  %3138 = vmatprep.subr.bf16.mxu0 %v4332_v32  ;;  %v4333_v17 = vld [vmem:[%s5042_s2 + $0x40] ss:$8 sps:$4 sm:$0xff]  }
 0xbad   : > { %2820 = vrot.lane.b32.xlu0 %v2816_v34, %s4697_s0  ;;  %v4142_v38 = vpop.f32.mrb[71].mxu0  ;;  %v4335_v34 = vld [vmem:[%s5042_s2 + $0x44] ss:$8 sps:$4 sm:$0xff]   ;;  %v4338_v35 = vld [vmem:[%s5042_s2 + $0x54] ss:$8 sps:$4 sm:$0xff]  }
 0xbae   : > { %v4341_v38 = vld [vmem:[%s5042_s2 + $0x64] ss:$8 sps:$4 sm:$0xff]  }
 0xbaf   : > { %3139 = vmatpush1.bf16.msra.mxu0 %v4330_v33 }
 0xbb0   : > { %3140 = vmatprep.subr.bf16.mxu0 %v4335_v34 }
 0xbb3   : > { %3141 = vmatpush1.bf16.msra.mxu0 %v4333_v17 }
 0xbb4   : > { %3142 = vmatprep.subr.bf16.mxu0 %v4338_v35 }
 0xbb7   : > { %3143 = vmatpush1.bf16.msra.mxu0 %v4336_v36 }
 0xbb8   : > { %3144 = vmatprep.subr.bf16.mxu0 %v4341_v38 }
 0xbbb   : > { %3145 = vmatpush1.bf16.msra.mxu0 %v4339_v41 }
 0xbbc   : > { %3146 = vmatprep.subr.bf16.mxu0 %v4344_v42 }
 0xbbf   : > { %3147 = vmatpush1.bf16.msra.mxu0 %v4342_v44 }
 0xbe3   : > { %v2810_v47 = vpop.f32.mrb[72].mxu0 }
 0xbe4   : > { %v2817_v48 = vpack.c.bf16 %v2810_v47, %v2762_v27  ;;  %v4153_v49 = vpop.f32.mrb[73].mxu0  ;;  %v4347_v47 = vld [vmem:[%s5088_s17 + $0x48] sm:$0xff]  }
 0xbe5   : > { %v2813_v51 = vpop.f32.mrb[74].mxu0  ;;  %v4349_v49 = vld [vmem:[%s5088_s17 + $0x50] sm:$0xff]  }
 0xbe6   : > { %2822 = vrot.lane.b32.xlu1 %v2817_v48, %s4697_s0  ;;  %v4154_v53 = vpop.f32.mrb[75].mxu0  ;;  %v4348_v48 = vld [vmem:[%s5088_s17 + $0x8] sm:$0xff]   ;;  %v4350_v51 = vld [vmem:[%s5088_s17 + $0x10] sm:$0xff]  }
 0xbe7   : > { %v4351_v53 = vld [vmem:[%s5088_s17 + $0x58] sm:$0xff]  }
 0xc1f   : > { %v2821_v54 = vpop.permute.xlu0 %2820 }
 0xc20   : > { %2827 = vst.msk [vmem:[#allocation3] sm:$0xff] %vm2826_vm6, %v2821_v54  ;;  %v4352_v54 = vld [vmem:[%s5088_s17 + $0x18] sm:$0xff]  }
 0xc27   : > { %v2829_v20 = vld [vmem:[#allocation3] sm:$0xff] }
 0xc28   : > { %4171 = vmatprep.mubr.bf16.mxu1 %v2829_v20  ;;  %v4353_v20 = vld [vmem:[%s5088_s17 + $0x60] sm:$0xff]  }
 0xc58   : > { %v2823_v55 = vpop.permute.xlu1 %2822 }
 0xc59   : > { %2828 = vst.msk [vmem:[#allocation3 + $0x8] sm:$0xff] %vm2826_vm6, %v2823_v55  ;;  %v4354_v55 = vld [vmem:[%s5088_s17 + $0x20] sm:$0xff]  }
 0xc60   : > { %v2830_v52 = vld [vmem:[#allocation3 + $0x8] sm:$0xff] }
 0xc61   : > { %4172 = vmatmul.mubr.bf16.vlgmr.msra.gmra.mrb[64].mxu1 %v2830_v52  ;;  %v4355_v52 = vld [vmem:[%s5088_s17 + $0x68] sm:$0xff]  }
 0xc62   : > { %3916 = vmatpush3.bf16.msra.mxu1 %v4346_v46 }
 0xc63   : > { %3917 = vmatprep.subr.bf16.mxu1 %v4347_v47 }
 0xc66   : > { %3918 = vmatpush3.bf16.msra.mxu1 %v4348_v48 }
 0xc67   : > { %3919 = vmatprep.subr.bf16.mxu1 %v4349_v49 }
 0xc6a   : > { %3920 = vmatpush3.bf16.msra.mxu1 %v4350_v51 }
 0xc6b   : > { %3921 = vmatprep.subr.bf16.mxu1 %v4351_v53 }
 0xc6e   : > { %3922 = vmatpush3.bf16.msra.mxu1 %v4352_v54 }
 0xc6f   : > { %3923 = vmatprep.subr.bf16.mxu1 %v4353_v20 }
 0xc72   : > { %3924 = vmatpush3.bf16.msra.mxu1 %v4354_v55 }
 0xc73   : > { %3925 = vmatprep.subr.bf16.mxu1 %v4355_v52 }
 0xd34   : > { %v4173_v0 = vpop.f32.mrb[64].mxu1 }
 0xd35   : > { %v2936_v21 = vpop.f32.mrb[65].mxu1  ;;  %v2945_v62 = vadd.f32 %v4173_v0, %v3768_v63 }
 0xd36   : > { %v2937_v19 = vadd.f32 %v3768_v63, %v2936_v21  ;;  %v4174_v58 = vpop.f32.mrb[66].mxu1 }
 0xd37   : > { %v2939_v59 = vpop.f32.mrb[67].mxu1  ;;  %v2948_v25 = vadd.f32 %v4174_v58, %v3768_v63  ;;  %v2953_v7 = vadd.f32 %v4443_v6, %v2945_v62  ;;  %v3777_v6 = vld [vmem:[%s5691_s7] ss:$0 sm:$0xff] }
 0xd38   : > { %v2940_v1 = vadd.f32 %v3768_v63, %v2939_v59  ;;  %v2951_v16 = vadd.f32 %v4441_v2, %v2937_v19 }
 0xd39   : > { %v2954_v11 = vadd.f32 %v4444_v10, %v2948_v25 }
 0xd3a   : > { %2955 = vadd.xlane.f32.xlu0 %v2951_v16  ;;  %v2952_v24 = vadd.f32 %v4442_v57, %v2940_v1 }
 0xd3c   : > { %2957 = vadd.xlane.f32.xlu1 %v2952_v24 }
 0xd3e   : > { %2959 = vadd.xlane.f32.xlu0 %v2953_v7 }
 0xd42   : > { %2961 = vadd.xlane.f32.xlu0 %v2954_v11 }
 0xdc7   : > { %v2956_v61 = vpop.xlane.xlu0 %2955 }
 0xdc8   : > { %v2964_v4 = vmul.f32 0.0078125, %v2956_v61 }
 0xdc9   : > { %v2958_v13 = vpop.xlane.xlu1 %2957 }
 0xdca   : > { %v5486_v14 = vsub.f32 %v2951_v16, %v2964_v4  ;;  %v2965_v5 = vmul.f32 0.0078125, %v2958_v13 }
 0xdcb   : > { %v2960_v3 = vpop.xlane.xlu0 %2959 }
 0xdcc   : > { %v5488_v9 = vsub.f32 %v2952_v24, %v2965_v5  ;;  %v2966_v15 = vmul.f32 0.0078125, %v2960_v3  ;;  %v2972_v18 = vmul.f32 %v5486_v14, %v5486_v14 }
 0xdce   : > { %v5492_v37 = vsub.f32 %v2953_v7, %v2966_v15  ;;  %2976 = vadd.xlane.f32.xlu0 %v2972_v18  ;;  %v2973_v22 = vmul.f32 %v5488_v9, %v5488_v9 }
 0xdcf   : > { %v2962_v23 = vpop.xlane.xlu0 %2961 }
 0xdd0   : > { %v2967_v26 = vmul.f32 0.0078125, %v2962_v23  ;;  %2978 = vadd.xlane.f32.xlu1 %v2973_v22  ;;  %v2974_v27 = vmul.f32 %v5492_v37, %v5492_v37  ;;  %v4356_v23 = vld [vmem:[%s5088_s17 + $0x28] sm:$0xff]  }
 0xdd1   : > { %3926 = vmatpush3.bf16.msra.mxu1 %v4356_v23 }
 0xdd2   : > { %v5498_v28 = vsub.f32 %v2954_v11, %v2967_v26  ;;  %2980 = vadd.xlane.f32.xlu0 %v2974_v27  ;;  %v4357_v26 = vld [vmem:[%s5088_s17 + $0x70] sm:$0xff]  }
 0xdd3   : > { %v4358_v27 = vld [vmem:[%s5088_s17 + $0x30] sm:$0xff]   ;;  %3927 = vmatprep.subr.bf16.mxu1 %v4357_v26 }
 0xdd4   : > { %v2975_v29 = vmul.f32 %v5498_v28, %v5498_v28 }
 0xdd5   : > { %3928 = vmatpush3.bf16.msra.mxu1 %v4358_v27 }
 0xdd6   : > { %2982 = vadd.xlane.f32.xlu1 %v2975_v29  ;;  %v4360_v29 = vld [vmem:[%s5088_s17 + $0x38] sm:$0xff]  }
 0xe5b   : > { %v2977_v63 = vpop.xlane.xlu0 %2976 }
 0xe5c   : > { %v2984_v0 = vmul.f32 0.0078125, %v2977_v63 }
 0xe5d   : > { %v2979_v21 = vpop.xlane.xlu1 %2978 }
 0xe5e   : > { %v2988_v19 = vadd.f32 1e-05, %v2984_v0  ;;  %v2985_v58 = vmul.f32 0.0078125, %v2979_v21 }
 0xe5f   : > { %v2981_v59 = vpop.xlane.xlu0 %2980 }
 0xe60   : > { %4425 = vrsqrt.f32 %v2988_v19  ;;  %v2989_v62 = vadd.f32 1e-05, %v2985_v58  ;;  %v2986_v1 = vmul.f32 0.0078125, %v2981_v59  ;;  %v3795_v59 = vld [vmem:[%s713_s12] ss:$0 sm:$0xff] }
 0xe62   : > { %4427 = vrsqrt.f32 %v2989_v62  ;;  %v2990_v2 = vadd.f32 1e-05, %v2986_v1 }
 0xe63   : > { %v2983_v16 = vpop.xlane.xlu1 %2982 }
 0xe64   : > { %4429 = vrsqrt.f32 %v2990_v2  ;;  %v2987_v57 = vmul.f32 0.0078125, %v2983_v16 }
 0xe66   : > { %v2991_v24 = vadd.f32 1e-05, %v2987_v57 }
 0xe68   : > { %4431 = vrsqrt.f32 %v2991_v24 }
 0xe6a   : > { %v4426_v25 = vpop.eup %4425 }
 0xe6b   : > { %v2996_v7 = vmul.f32 %v4426_v25, %v5486_v14 }
 0xe6c   : > { %v4428_v10 = vpop.eup %4427 }
 0xe6d   : > { %v2997_v11 = vmul.f32 %v4428_v10, %v5488_v9  ;;  %v3007_v12 = vmul.f32 %v3777_v6, %v2996_v7 }
 0xe6e   : > { %v4430_v50 = vpop.eup %4429 }
 0xe6f   : > { %v3008_v60 = vmul.f32 %v3777_v6, %v2997_v11  ;;  %v5537_v61 = vadd.f32 %v3778_v56, %v3007_v12  ;;  %v2998_v13 = vmul.f32 %v4430_v50, %v5492_v37 }
 0xe71   : > { %v5539_v4 = vadd.f32 %v3778_v56, %v3008_v60  ;;  %v3009_v9 = vmul.f32 %v3777_v6, %v2998_v13 }
 0xe72   : > { %v4432_v14 = vpop.eup %4431 }
 0xe73   : > { %v3022_v5 = vpack.c.bf16 %v5539_v4, %v5537_v61  ;;  %v2999_v3 = vmul.f32 %v4432_v14, %v5498_v28  ;;  %v5548_v22 = vadd.f32 %v3778_v56, %v3009_v9  ;;  %v4359_v28 = vld [vmem:[%s5088_s17 + $0x78] sm:$0xff]  }
 0xe74   : > { %3929 = vmatprep.subr.bf16.mxu1 %v4359_v28 }
 0xe75   : > { %3165 = vmatmul.mubr.bf16.vlgmr.msra.gmra.mrb[76].mxu0 %v3022_v5  ;;  %v3010_v15 = vmul.f32 %v3777_v6, %v2999_v3  ;;  %3930 = vmatpush3.bf16.msra.mxu1 %v4360_v29 }
 0xe76   : > { %3174 = vmatprep.mubr.bf16.mxu0 %v4694_v8  ;;  %v3045_v8 = vrot.slane %v3040_v30, %v780_v43 }
 0xe77   : > { %v5546_v18 = vadd.f32 %v3778_v56, %v3010_v15 }
 0xe79   : > { %v3023_v37 = vpack.c.bf16 %v5546_v18, %v5548_v22 }
 0xe7d   : > { %3175 = vmatmul.mubr.bf16.gmra.mrb[80].mxu0 %v3023_v37 }
 0xf48   : > { %v3166_v32 = vpop.f32.mrb[76].mxu0 }
 0xf49   : > { %v3167_v33 = vadd.f32 %v3166_v32, %v3045_v8  ;;  %v3168_v34 = vpop.f32.mrb[77].mxu0 }
 0xf4a   : > { %v3169_v17 = vadd.f32 %v3168_v34, %v3049_v31  ;;  %v3170_v35 = vpop.f32.mrb[78].mxu0 }
 0xf4b   : > { %v3171_v36 = vadd.f32 %v3170_v35, %v3045_v8  ;;  %v3172_v38 = vpop.f32.mrb[79].mxu0  ;;  %v3185_v42 = vmax.f32 %v3167_v33, 0.0 }
 0xf4c   : > { %v3173_v41 = vadd.f32 %v3172_v38, %v3049_v31  ;;  %v3186_v45 = vmax.f32 %v3169_v17, 0.0 }
 0xf4d   : > { %v3187_v44 = vmax.f32 %v3171_v36, 0.0 }
 0xf4e   : > { %v3188_v46 = vmax.f32 %v3173_v41, 0.0 }
 0xf4f   : > { %v3193_v47 = vpack.c.bf16 %v3187_v44, %v3185_v42 }
 0xf50   : > { %v3194_v48 = vpack.c.bf16 %v3188_v46, %v3186_v45  ;;  %v3176_v49 = vpop.f32.mrb[80].mxu0 }
 0xf51   : > { %v3177_v51 = vadd.f32 %v3176_v49, %v3045_v8  ;;  %v3178_v43 = vpop.f32.mrb[81].mxu0  ;;  %v3812_v49 = vld [vmem:[%s716_s30] ss:$0 sm:$0xff] }
 0xf52   : > { %v3179_v53 = vadd.f32 %v3178_v43, %v3049_v31  ;;  %v3180_v39 = vpop.f32.mrb[82].mxu0  ;;  %3364 = vmatprep.mubr.bf16.mxu1 %v3194_v48 }
 0xf53   : > { %v3181_v40 = vadd.f32 %v3180_v39, %v3045_v8  ;;  %v3182_v54 = vpop.f32.mrb[83].mxu0  ;;  %3365 = vmatmul.mubr.bf16.vlgmr.msra.gmra.mrb[68].mxu1 %v3193_v47  ;;  %v3189_v55 = vmax.f32 %v3177_v51, 0.0 }
 0xf54   : > { %v3183_v20 = vadd.f32 %v3182_v54, %v3049_v31  ;;  %v3190_v63 = vmax.f32 %v3179_v53, 0.0  ;;  %v3813_v53 = vld [vmem:[%s719_s13] ss:$0 sm:$0xff] }
 0xf55   : > { %v3191_v52 = vmax.f32 %v3181_v40, 0.0 }
 0xf56   : > { %v3192_v0 = vmax.f32 %v3183_v20, 0.0 }
 0xf57   : > { %v3195_v21 = vpack.c.bf16 %v3191_v52, %v3189_v55 }
 0xf58   : > { %v3196_v19 = vpack.c.bf16 %v3192_v0, %v3190_v63 }
 0xf5a   : > { %3372 = vmatprep.mubr.bf16.mxu1 %v3196_v19 }
 0xf5b   : > { %3373 = vmatmul.mubr.bf16.gmra.mrb[72].mxu1 %v3195_v21 }
0x1026   : > { %v3931_v58 = vpop.f32.mrb[68].mxu1 }
0x1027   : > { %v3932_v62 = vpop.f32.mrb[69].mxu1 }
0x1028   : > { %v3933_v1 = vadd.f32 %v3932_v62, %v3931_v58  ;;  %v3934_v2 = vpop.f32.mrb[70].mxu1 }
0x1029   : > { %v3935_v16 = vpop.f32.mrb[71].mxu1 }
0x102a   : > { %v3367_v57 = vadd.f32 %v3933_v1, %v3795_v59  ;;  %v3936_v24 = vadd.f32 %v3935_v16, %v3934_v2 }
0x102c   : > { %v3370_v25 = vadd.f32 %v3936_v24, %v3795_v59  ;;  %v3381_v6 = vadd.f32 %v3367_v57, %v5537_v61 }
0x102e   : > { %v3937_v7 = vpop.f32.mrb[72].mxu1  ;;  %3385 = vadd.xlane.f32.xlu0 %v3381_v6  ;;  %v3382_v10 = vadd.f32 %v3370_v25, %v5539_v4 }
0x102f   : > { %v3938_v11 = vpop.f32.mrb[73].mxu1 }
0x1030   : > { %v3939_v12 = vadd.f32 %v3938_v11, %v3937_v7  ;;  %v3940_v50 = vpop.f32.mrb[74].mxu1  ;;  %3387 = vadd.xlane.f32.xlu1 %v3382_v10 }
0x1031   : > { %v3941_v56 = vpop.f32.mrb[75].mxu1 }
0x1032   : > { %v3375_v60 = vadd.f32 %v3939_v12, %v3795_v59  ;;  %v3942_v13 = vadd.f32 %v3941_v56, %v3940_v50 }
0x1034   : > { %v3378_v14 = vadd.f32 %v3942_v13, %v3795_v59  ;;  %v3383_v5 = vadd.f32 %v3375_v60, %v5548_v22 }
0x1036   : > { %3389 = vadd.xlane.f32.xlu0 %v3383_v5  ;;  %v3384_v3 = vadd.f32 %v3378_v14, %v5546_v18 }
0x1038   : > { %3391 = vadd.xlane.f32.xlu1 %v3384_v3 }
0x10bb   : > { %v3386_v9 = vpop.xlane.xlu0 %3385 }
0x10bc   : > { %v3393_v61 = vmul.f32 0.0078125, %v3386_v9 }
0x10bd   : > { %v3388_v15 = vpop.xlane.xlu1 %3387 }
0x10be   : > { %v3397_v37 = vsub.f32 %v3381_v6, %v3393_v61  ;;  %v3394_v23 = vmul.f32 0.0078125, %v3388_v15 }
0x10c0   : > { %v3398_v4 = vsub.f32 %v3382_v10, %v3394_v23  ;;  %v3401_v26 = vmul.f32 %v3397_v37, %v3397_v37 }
0x10c2   : > { %3405 = vadd.xlane.f32.xlu0 %v3401_v26  ;;  %v3402_v27 = vmul.f32 %v3398_v4, %v3398_v4 }
0x10c3   : > { %v3390_v28 = vpop.xlane.xlu0 %3389 }
0x10c4   : > { %v3395_v29 = vmul.f32 0.0078125, %v3390_v28  ;;  %3407 = vadd.xlane.f32.xlu1 %v3402_v27 }
0x10c5   : > { %v3392_v30 = vpop.xlane.xlu1 %3391 }
0x10c6   : > { %v3399_v8 = vsub.f32 %v3383_v5, %v3395_v29  ;;  %v3396_v31 = vmul.f32 0.0078125, %v3392_v30 }
0x10c8   : > { %v3400_v22 = vsub.f32 %v3384_v3, %v3396_v31  ;;  %v3403_v32 = vmul.f32 %v3399_v8, %v3399_v8 }
0x10ca   : > { %3409 = vadd.xlane.f32.xlu0 %v3403_v32  ;;  %v3404_v18 = vmul.f32 %v3400_v22, %v3400_v22 }
0x10cc   : > { %3411 = vadd.xlane.f32.xlu1 %v3404_v18 }
0x114f   : > { %v3406_v33 = vpop.xlane.xlu0 %3405 }
0x1150   : > { %v3413_v34 = vmul.f32 0.0078125, %v3406_v33 }
0x1151   : > { %v3408_v17 = vpop.xlane.xlu1 %3407 }
0x1152   : > { %v3417_v35 = vadd.f32 1e-05, %v3413_v34  ;;  %v3414_v36 = vmul.f32 0.0078125, %v3408_v17 }
0x1154   : > { %4433 = vrsqrt.f32 %v3417_v35  ;;  %v3418_v38 = vadd.f32 1e-05, %v3414_v36 }
0x1156   : > { %4435 = vrsqrt.f32 %v3418_v38 }
0x1157   : > { %v3410_v41 = vpop.xlane.xlu0 %3409 }
0x1158   : > { %v3415_v42 = vmul.f32 0.0078125, %v3410_v41 }
0x1159   : > { %v3412_v44 = vpop.xlane.xlu1 %3411 }
0x115a   : > { %v3419_v45 = vadd.f32 1e-05, %v3415_v42  ;;  %v3416_v46 = vmul.f32 0.0078125, %v3412_v44 }
0x115c   : > { %4437 = vrsqrt.f32 %v3419_v45  ;;  %v3420_v47 = vadd.f32 1e-05, %v3416_v46 }
0x115e   : > { %v4434_v48 = vpop.eup %4433  ;;  %4439 = vrsqrt.f32 %v3420_v47 }
0x115f   : > { %v3425_v51 = vmul.f32 %v4434_v48, %v3397_v37 }
0x1160   : > { %v4436_v43 = vpop.eup %4435 }
0x1161   : > { %v3436_v39 = vmul.f32 %v3812_v49, %v3425_v51  ;;  %v3426_v40 = vmul.f32 %v4436_v43, %v3398_v4 }
0x1163   : > { %v3447_v54 = vadd.f32 %v3813_v53, %v3436_v39  ;;  %v3437_v20 = vmul.f32 %v3812_v49, %v3426_v40 }
0x1165   : > { %3451 = vst [vmem:[#allocation2] sm:$0xff] %v3447_v54  ;;  %v3448_v55 = vadd.f32 %v3813_v53, %v3437_v20  ;;  %3459 = vst [vmem:[#allocation13] sm:$0xff] (!%p3814_p11), %v3447_v54 }
0x1166   : > { %v4438_v52 = vpop.eup %4437 }
0x1167   : > { %3452 = vst [vmem:[#allocation2 + $0x8] sm:$0xff] %v3448_v55  ;;  %v3427_v63 = vmul.f32 %v4438_v52, %v3399_v8  ;;  %3460 = vst [vmem:[#allocation13 + $0x8] sm:$0xff] (!%p3814_p11), %v3448_v55 }
0x1168   : > { %v4440_v0 = vpop.eup %4439 }
0x1169   : > { %v3438_v21 = vmul.f32 %v3812_v49, %v3427_v63  ;;  %v3428_v19 = vmul.f32 %v4440_v0, %v3400_v22  ;;  %3458 = sbr.rel (%p3814_p11) target bundleno = 4464 (0x1170), region = 100 }
0x116b   : > { %v3449_v58 = vadd.f32 %v3813_v53, %v3438_v21  ;;  %v3439_v59 = vmul.f32 %v3812_v49, %v3428_v19 }
0x116d   : > { %3453 = vst [vmem:[#allocation2 + $0x10] sm:$0xff] %v3449_v58  ;;  %v3450_v62 = vadd.f32 %v3813_v53, %v3439_v59  ;;  %3461 = vst [vmem:[#allocation13 + $0x10] sm:$0xff] (!%p3814_p11), %v3449_v58 }
0x116f   : > { %3454 = vst [vmem:[#allocation2 + $0x18] sm:$0xff] %v3450_v62  ;;  %3462 = vst [vmem:[#allocation13 + $0x18] sm:$0xff] (!%p3814_p11), %v3450_v62 }
0x1170 PF: > { %p4215_p6 = scmp.eq.s32.totalorder %s4916_s27, 1  ;;  %s4700_s8 = smov [#allocation13]  }
0x1171   : > { %s3472_s30 = sshll.u32 %s4700_s8, 4  ;;  %s3473_s30 = int_to_ptr.vmem [resolvable:$true] %s3472_s30 }
0x1172   : > { %s4593_s20 = scalar_lea.vmem %s3473_s30, 512  ;;  %p4600_p13 = scmp.lt.s32.totalorder %s3473_s30, %s3473_s30 }
0x1173   : > { %p4594_p3 = scmp.ne.s32.totalorder %s3473_s30, %s4593_s20  ;;  %p4601_p2 = scmp.lt.s32.totalorder %s4593_s20, %s4593_s20 }
0x1175   : > { %p4595_p9 = pnand %p4594_p3, %p4215_p6  ;;  %p4602_p0 = por %p4601_p2, %p4600_p13 }
0x1177   : > { %p4596_p10 = pneg %p4595_p9 }
0x1179   : > { %p4603_p8 = pnand %p4602_p0, %p4596_p10 }
0x117b   : > { %4606 = shalt.err (!%p4603_p8)
}
0x117c   : > { %s5696_s17 = sld [smem:[#allocation34_spill]] }
0x1182   : > { %s4607_s0 = scalar_lea.hbm %s5696_s17, 512 }
0x1183   : > { %p4608_p1 = scmp.ne.s32.totalorder %s5696_s17, %s4607_s0  ;;  %p4613_p7 = scmp.lt.u32.totalorder %s4607_s0, %s5696_s17 }
0x1185   : > { %p4609_p12 = pnand %p4608_p1, %p4215_p6 }
0x1187   : > { %p4610_p4 = pneg %p4609_p12 }
0x1189   : > { %p4615_p5 = pnand %p4613_p7, %p4610_p4 }
0x118b   : > { %4618 = shalt.err (!%p4615_p5)
}
0x118c   : > { %s4701_s24 = smov 128   ;;  %s4702_s2 = smov 8  }
0x118d   : > { %4192 = dma.vmem_to_hbm [thread:$0]  (%p4215_p6), %s3473_s30, 512, %s5696_s17, [#allocation6], %s4701_s24, %s4701_s24, %s4702_s2  }
0x118e   : > { %4656 = dma.done.wait (%p4215_p6), [#allocation6], 512  }
0x118f   : > { %4658 = vsyncadd (%p4215_p6), [#allocation6], 4294966784 }
0x1190 PF: > { %s5697_s11 = sld [smem:[#allocation21_spill]]  ;;  %s5698_s25 = sld [smem:[#allocation18_spill]] }
0x1191   : > { %s5699_s26 = sld [smem:[#allocation19_spill]]  ;;  %s5700_s27 = sld [smem:[#allocation23_spill]] }
0x1192   : > { %s5701_s28 = sld [smem:[#allocation20_spill]]  ;;  %s5702_s29 = sld [smem:[#allocation22_spill]] }
0x1196   : > { %s31_s30 = sadd.s32 1, %s5697_s11  }
0x1197   : > { %p28_p11 = scmp.ge.s32.totalorder %s31_s30, 4  }
0x1199   :  { %30 = sbr.rel (!%p28_p11) target bundleno = 20 (0x14), region = 183 }
0x11a0   :  { %3488 = vsyncpa [#allocation5], 1 }
0x11a1   :  { %3490 = vsyncpa [#allocation5 + $0x1], 1 }
0x11a2   :  { %3491 = vsyncpa [#allocation8], 1 }
0x11a3   :  { %3493 = vsyncpa [#allocation8 + $0x1], 1 }
0x11a4   :  { %3494 = vsyncpa [#allocation11], 1 }
0x11a5   :  { %3496 = vsyncpa [#allocation11 + $0x1], 1 }
0x11a6   :  { %3497 = vsyncpa [#allocation6], 1 }
0x11a7   :  { %3499 = vsyncpa [#allocation6 + $0x1], 1 }

</bundles_post_ra>
